<compile_context>
chip_gen: v7x
topology: tpu7x:2x2x1
jax: 0.10.0
libtpu: 0.0.40
codegen_flags: <defaults>
</compile_context>

<pallas_src>
import functools

import jax
import jax.numpy as jnp
from jax.experimental import pallas as pl
from jax.experimental.pallas import tpu as pltpu


# ---------------------------------------------------------------------------
# helpers
# ---------------------------------------------------------------------------

_VMEM_LIMIT = 32 * 1024 * 1024  # safe on v5e (raises 16MiB default), v6e, v7x


def _round_up(x, m):
    return ((x + m - 1) // m) * m


def _pad2d(x, rows, cols):
    r, c = x.shape
    if r == rows and c == cols:
        return x
    return jnp.pad(x, ((0, rows - r), (0, cols - c)))


# ---------------------------------------------------------------------------
# kernels
# ---------------------------------------------------------------------------

def _linear_kernel(x_ref, w_ref, b_ref, o_ref, acc_ref, *, apply_relu):
    """Tiled matmul with K-reduction accumulator; fused bias (+ optional ReLU)."""
    k = pl.program_id(2)

    @pl.when(k == 0)
    def _():
        acc_ref[...] = jnp.zeros_like(acc_ref)

    acc_ref[...] += jnp.dot(x_ref[...], w_ref[...],
                            preferred_element_type=jnp.float32)

    @pl.when(k == pl.num_programs(2) - 1)
    def _():
        y = acc_ref[...] + b_ref[...]
        if apply_relu:
            y = jnp.maximum(y, 0.0)
        o_ref[...] = y.astype(o_ref.dtype)


def _heads_kernel(x_ref, w_ref, b_ref, o_ref, acc_ref, *, n_cls):
    """Fused classifier+regressor matmul with softmax epilogue.

    The weight is [wc | wr] concatenated along N and padded to 128 lanes; the
    softmax is applied (in f32) only to the first `n_cls` columns, the rest are
    raw linear outputs (regressor / padding).  Single lane-dense 128-wide store.
    """
    k = pl.program_id(1)

    @pl.when(k == 0)
    def _():
        acc_ref[...] = jnp.zeros_like(acc_ref)

    acc_ref[...] += jnp.dot(x_ref[...], w_ref[...],
                            preferred_element_type=jnp.float32)

    @pl.when(k == pl.num_programs(1) - 1)
    def _():
        y = acc_ref[...] + b_ref[...]
        col = jax.lax.broadcasted_iota(jnp.int32, y.shape, 1)
        is_cls = col < n_cls
        neg_inf = jnp.full_like(y, -jnp.inf)
        m = jnp.max(jnp.where(is_cls, y, neg_inf), axis=-1, keepdims=True)
        e = jnp.where(is_cls, jnp.exp(y - m), 0.0)
        s = jnp.sum(e, axis=-1, keepdims=True)
        softmaxed = e / s
        o_ref[...] = jnp.where(is_cls, softmaxed, y).astype(o_ref.dtype)


# ---------------------------------------------------------------------------
# wrappers
# ---------------------------------------------------------------------------

def pallas_linear(x, w, b, *, relu, out_dtype=None, tm=256, tn=512, tk=1024):
    """y = x @ w + b (optionally ReLU).  x:(M,K), w:(K,N), b:(N,).

    Operands are zero-padded to tile multiples (no full-extent fallback), so
    every block stays (16,128)-aligned and bounded in VMEM.
    """
    M, K = x.shape
    K2, N = w.shape
    assert K == K2 and b.shape == (N,)
    out_dtype = out_dtype or x.dtype

    # Tile sizes (16-aligned sublanes for bf16, 128-aligned lanes).
    tm = min(tm, _round_up(M, 16))
    tn = min(tn, _round_up(N, 128))
    tk = min(tk, _round_up(K, 128))
    Mp, Np, Kp = _round_up(M, tm), _round_up(N, tn), _round_up(K, tk)

    xp = _pad2d(x, Mp, Kp)
    wp = _pad2d(w, Kp, Np)
    bp = jnp.pad(b.astype(jnp.float32), (0, Np - N)).reshape(1, Np)

    grid = (Mp // tm, Np // tn, Kp // tk)
    kernel = functools.partial(_linear_kernel, apply_relu=relu)

    cost = pl.CostEstimate(
        flops=2 * M * K * N,
        transcendentals=0,
        bytes_accessed=(xp.size * xp.dtype.itemsize
                        + wp.size * wp.dtype.itemsize
                        + Mp * Np * jnp.dtype(out_dtype).itemsize),
    )

    out = pl.pallas_call(
        kernel,
        out_shape=jax.ShapeDtypeStruct((Mp, Np), out_dtype),
        grid_spec=pltpu.PrefetchScalarGridSpec(
            num_scalar_prefetch=0,
            grid=grid,
            in_specs=[
                pl.BlockSpec((tm, tk), lambda i, j, k: (i, k)),
                pl.BlockSpec((tk, tn), lambda i, j, k: (k, j)),
                pl.BlockSpec((1, tn), lambda i, j, k: (0, j)),
            ],
            out_specs=pl.BlockSpec((tm, tn), lambda i, j, k: (i, j)),
            scratch_shapes=[pltpu.VMEM((tm, tn), jnp.float32)],
        ),
        compiler_params=pltpu.CompilerParams(
            dimension_semantics=("parallel", "parallel", "arbitrary"),
            vmem_limit_bytes=_VMEM_LIMIT,
        ),
        cost_estimate=cost,
    )(xp, wp, bp)
    return out[:M, :N]


def pallas_cls_reg_heads(x, wc, bc, wr, br, *, tm=256, tk=1024):
    """Fused classifier (+softmax) and regressor on shared input x:(M,K)."""
    M, K = x.shape
    n_cls = wc.shape[1]
    n_reg = wr.shape[1]
    N = n_cls + n_reg
    Np = _round_up(N, 128)                 # lane-dense output width

    w = jnp.concatenate([wc, wr], axis=1)  # (K, n_cls + n_reg)
    b = jnp.concatenate([bc, br], axis=0)

    tm = min(tm, _round_up(M, 16))
    tk = min(tk, _round_up(K, 128))
    Mp, Kp = _round_up(M, tm), _round_up(K, tk)

    xp = _pad2d(x, Mp, Kp)
    wp = _pad2d(w, Kp, Np)
    bp = jnp.pad(b.astype(jnp.float32), (0, Np - N)).reshape(1, Np)

    grid = (Mp // tm, Kp // tk)
    kernel = functools.partial(_heads_kernel, n_cls=n_cls)

    cost = pl.CostEstimate(
        flops=2 * M * K * N,
        transcendentals=M * n_cls,
        bytes_accessed=(xp.size * xp.dtype.itemsize
                        + wp.size * wp.dtype.itemsize
                        + Mp * Np * 4),
    )

    out = pl.pallas_call(
        kernel,
        out_shape=jax.ShapeDtypeStruct((Mp, Np), jnp.float32),
        grid_spec=pltpu.PrefetchScalarGridSpec(
            num_scalar_prefetch=0,
            grid=grid,
            in_specs=[
                pl.BlockSpec((tm, tk), lambda i, k: (i, k)),
                pl.BlockSpec((tk, Np), lambda i, k: (k, 0)),
                pl.BlockSpec((1, Np), lambda i, k: (0, 0)),
            ],
            out_specs=pl.BlockSpec((tm, Np), lambda i, k: (i, 0)),
            scratch_shapes=[pltpu.VMEM((tm, Np), jnp.float32)],
        ),
        compiler_params=pltpu.CompilerParams(
            dimension_semantics=("parallel", "arbitrary"),
            vmem_limit_bytes=_VMEM_LIMIT,
        ),
        cost_estimate=cost,
    )(xp, wp, bp)

    score = out[:M, :n_cls]
    bbox_delta = out[:M, n_cls:n_cls + n_reg]
    return score, bbox_delta


# ---------------------------------------------------------------------------
# model
# ---------------------------------------------------------------------------

def init_params(key, feat_dim, hidden, class_num):
    """Synthetic parameters.  Weights stored as (in, out) = PyTorch W.T, in bf16
    (weight streaming is the bandwidth bottleneck); biases kept f32."""
    ks = jax.random.split(key, 8)
    s = 0.01
    bf16 = jnp.bfloat16
    return {
        "w1": (s * jax.random.normal(ks[0], (feat_dim, hidden), jnp.float32)).astype(bf16),
        "b1": s * jax.random.normal(ks[1], (hidden,), jnp.float32),
        "w2": (s * jax.random.normal(ks[2], (hidden, hidden), jnp.float32)).astype(bf16),
        "b2": s * jax.random.normal(ks[3], (hidden,), jnp.float32),
        "wc": (s * jax.random.normal(ks[4], (hidden, class_num + 1), jnp.float32)).astype(bf16),
        "bc": s * jax.random.normal(ks[5], (class_num + 1,), jnp.float32),
        "wr": (s * jax.random.normal(ks[6], (hidden, (class_num + 1) * 4), jnp.float32)).astype(bf16),
        "br": s * jax.random.normal(ks[7], ((class_num + 1) * 4,), jnp.float32),
    }


def faster_rcnn_head(pooled_feature, params):
    """pooled_feature: (R, C, 7, 7) NCHW  ->  (score, bbox_delta)."""
    R = pooled_feature.shape[0]
    x = pooled_feature.reshape(R, -1).astype(jnp.bfloat16)   # .view(-1, C*7*7)
    h1 = pallas_linear(x, params["w1"], params["b1"], relu=True)    # fc1+ReLU (+Dropout=id)
    h2 = pallas_linear(h1, params["w2"], params["b2"], relu=True)   # fc2+ReLU (+Dropout=id)
    # classifier + Softmax(dim=1) + regressor fused into one lane-dense kernel
    score, bbox_delta = pallas_cls_reg_heads(
        h2, params["wc"], params["bc"], params["wr"], params["br"])
    return score, bbox_delta


# ---------------------------------------------------------------------------
# main
# ---------------------------------------------------------------------------

if __name__ == "__main__":
    key = jax.random.PRNGKey(0)
    k_in, k_par = jax.random.split(key)

    # Small shapes consistent with the head structure (C*7*7 -> hidden -> heads).
    NUM_ROIS = 16          # rows fed to the FC head ("-1" in .view(-1, C*7*7))
    CHANNELS = 64          # stands in for the module's 512
    POOL = 7               # fixed by the module (7x7 ROI pool)
    HIDDEN = 512           # stands in for the module's 4096
    CLASS_NUM = 10         # -> classifier out = 11, regressor out = 44

    feat_dim = CHANNELS * POOL * POOL  # 3136

    pooled = jax.random.normal(k_in, (NUM_ROIS, CHANNELS, POOL, POOL), jnp.float32)
    params = init_params(k_par, feat_dim, HIDDEN, CLASS_NUM)

    score, bbox_delta = faster_rcnn_head(pooled, params)
    score, bbox_delta = jax.block_until_ready((score, bbox_delta))

    # Pure-JAX reference (bf16-faithful: same casts as the Pallas path).
    f32 = jnp.float32
    x_ref = pooled.reshape(NUM_ROIS, -1).astype(jnp.bfloat16).astype(f32)
    w1, w2 = params["w1"].astype(f32), params["w2"].astype(f32)
    wc, wr = params["wc"].astype(f32), params["wr"].astype(f32)
    h1_ref = jnp.maximum(x_ref @ w1 + params["b1"], 0.0).astype(jnp.bfloat16).astype(f32)
    h2_ref = jnp.maximum(h1_ref @ w2 + params["b2"], 0.0).astype(jnp.bfloat16).astype(f32)
    logits_ref = h2_ref @ wc + params["bc"]
    score_ref = jax.nn.softmax(logits_ref, axis=-1)
    bbox_ref = h2_ref @ wr + params["br"]

    assert score.shape == (NUM_ROIS, CLASS_NUM + 1)
    assert bbox_delta.shape == (NUM_ROIS, (CLASS_NUM + 1) * 4)
    assert jnp.allclose(score, score_ref, atol=2e-3, rtol=2e-2)
    assert jnp.allclose(bbox_delta, bbox_ref, atol=2e-3, rtol=2e-2)
    assert jnp.allclose(jnp.sum(score, axis=-1), 1.0, atol=1e-3)

    print("KERNEL_OK")
</pallas_src>

<mosaic_0001>
module attributes {stable_mosaic.version = 11 : i64} {
  func.func @_linear_kernel(%arg0: i32, %arg1: i32, %arg2: i32, %arg3: memref<16x1024xbf16, #tpu.memory_space<vmem>>, %arg4: memref<1024x512xbf16, #tpu.memory_space<vmem>>, %arg5: memref<1x512xf32, #tpu.memory_space<vmem>>, %arg6: memref<16x512xbf16, #tpu.memory_space<vmem>>, %arg7: memref<16x512xf32, #tpu.memory_space<vmem>>) attributes {dimension_semantics = [#tpu.dimension_semantics<parallel>, #tpu.dimension_semantics<parallel>, #tpu.dimension_semantics<arbitrary>], iteration_bounds = array<i64: 1, 1, 4>, scalar_prefetch = 0 : i64, scratch_operands = 1 : i64, tpu.core_type = #tpu.core_type<tc>, window_params = [{transform_indices = @transform_0, window_bounds = array<i64: 16, 1024>}, {transform_indices = @transform_1, window_bounds = array<i64: 1024, 512>}, {transform_indices = @transform_2, window_bounds = array<i64: 1, 512>}, {transform_indices = @transform_3, window_bounds = array<i64: 16, 512>}]} {
    %c0_i32 = arith.constant 0 : i32
    %0 = arith.cmpi eq, %arg2, %c0_i32 : i32
    %1 = arith.extui %0 : i1 to i32
    %c0_i32_0 = arith.constant 0 : i32
    %2 = arith.cmpi ne, %1, %c0_i32_0 : i32
    scf.if %2 {
      %cst_9 = arith.constant 0.000000e+00 : f32
      %12 = vector.broadcast %cst_9 : f32 to vector<16x512xf32>
      %c0_10 = arith.constant 0 : index
      %c0_11 = arith.constant 0 : index
      %13 = vector.load %arg7[%c0_10, %c0_11] : memref<16x512xf32, #tpu.memory_space<vmem>>, vector<16x512xf32>
      tpu.vector_store %arg7[%c0_10, %c0_11], %12 {strides = array<i32>} : memref<16x512xf32, #tpu.memory_space<vmem>>, vector<16x512xf32>,
    } else {
    }
    %c0 = arith.constant 0 : index
    %c0_1 = arith.constant 0 : index
    %3 = vector.load %arg7[%c0, %c0_1] : memref<16x512xf32, #tpu.memory_space<vmem>>, vector<16x512xf32>
    %c0_2 = arith.constant 0 : index
    %c0_3 = arith.constant 0 : index
    %4 = vector.load %arg3[%c0_2, %c0_3] : memref<16x1024xbf16, #tpu.memory_space<vmem>>, vector<16x1024xbf16>
    %c0_4 = arith.constant 0 : index
    %c0_5 = arith.constant 0 : index
    %5 = vector.load %arg4[%c0_4, %c0_5] : memref<1024x512xbf16, #tpu.memory_space<vmem>>, vector<1024x512xbf16>
    %cst = arith.constant dense<0.000000e+00> : vector<16x512xf32>
    %6 = tpu.matmul %4, %5, %cst {dimension_numbers = #tpu.dot_dimension_numbers<[1], [0], [0], [1], [0, 0, 1, 1], [], []>} : vector<16x1024xbf16>, vector<1024x512xbf16>, vector<16x512xf32> -> vector<16x512xf32>
    %7 = arith.addf %3, %6 : vector<16x512xf32>
    %c0_6 = arith.constant 0 : index
    %c0_7 = arith.constant 0 : index
    %8 = vector.load %arg7[%c0_6, %c0_7] : memref<16x512xf32, #tpu.memory_space<vmem>>, vector<16x512xf32>
    tpu.vector_store %arg7[%c0_6, %c0_7], %7 {strides = array<i32>} : memref<16x512xf32, #tpu.memory_space<vmem>>, vector<16x512xf32>,
    %c3_i32 = arith.constant 3 : i32
    %9 = arith.cmpi eq, %arg2, %c3_i32 : i32
    %10 = arith.extui %9 : i1 to i32
    %c0_i32_8 = arith.constant 0 : i32
    %11 = arith.cmpi ne, %10, %c0_i32_8 : i32
    scf.if %11 {
      %c0_9 = arith.constant 0 : index
      %c0_10 = arith.constant 0 : index
      %12 = vector.load %arg7[%c0_9, %c0_10] : memref<16x512xf32, #tpu.memory_space<vmem>>, vector<16x512xf32>
      %c0_11 = arith.constant 0 : index
      %c0_12 = arith.constant 0 : index
      %13 = vector.load %arg5[%c0_11, %c0_12] : memref<1x512xf32, #tpu.memory_space<vmem>>, vector<1x512xf32>
      %14 = vector.broadcast %13 : vector<1x512xf32> to vector<16x512xf32>
      %15 = arith.addf %12, %14 : vector<16x512xf32>
      %cst_13 = arith.constant 0.000000e+00 : f32
      %16 = vector.broadcast %cst_13 : f32 to vector<16x512xf32>
      %17 = arith.maximumf %15, %16 : vector<16x512xf32>
      %18 = arith.truncf %17 : vector<16x512xf32> to vector<16x512xbf16>
      %c0_14 = arith.constant 0 : index
      %c0_15 = arith.constant 0 : index
      %19 = vector.load %arg6[%c0_14, %c0_15] : memref<16x512xbf16, #tpu.memory_space<vmem>>, vector<16x512xbf16>
      tpu.vector_store %arg6[%c0_14, %c0_15], %18 {strides = array<i32>} : memref<16x512xbf16, #tpu.memory_space<vmem>>, vector<16x512xbf16>,
    } else {
    }
    return
  }
  func.func @transform_0(%arg0: i32, %arg1: i32, %arg2: i32) -> (i32, i32) {
    %c0_i32 = arith.constant 0 : i32
    return %arg0, %arg2 : i32, i32
  }
  func.func @transform_1(%arg0: i32, %arg1: i32, %arg2: i32) -> (i32, i32) {
    %c0_i32 = arith.constant 0 : i32
    return %arg2, %arg1 : i32, i32
  }
  func.func @transform_2(%arg0: i32, %arg1: i32, %arg2: i32) -> (i32, i32) {
    %c0_i32 = arith.constant 0 : i32
    %c0_i32_0 = arith.constant 0 : i32
    return %c0_i32, %arg1 : i32, i32
  }
  func.func @transform_3(%arg0: i32, %arg1: i32, %arg2: i32) -> (i32, i32) {
    %c0_i32 = arith.constant 0 : i32
    return %arg0, %arg1 : i32, i32
  }
}

</mosaic_0001>

<bundles_post_ra>
// kernel: tpu_custom_call.1
= control target key start
LH: loop header
LB: loop body
LE: loop exit
PB: predicated region body
PF: predicated region fallthrough
CT: control target
= control target key end

     0   :  { %s3961_s0 = inlined_call_operand.hbm [shape: bf16[16,4096], index: 0, kind: input, shape index: {}]   ;;  %s3962_s1 = inlined_call_operand.hbm [shape: bf16[4096,512], index: 1, kind: input, shape index: {}]   ;;  %s3963_s2 = inlined_call_operand.hbm [shape: f32[1,512], index: 2, kind: input, shape index: {}]   ;;  %s3964_s3 = inlined_call_operand.hbm [shape: bf16[16,512], index: 3, kind: output, shape index: {}]  }
   0x1   :  { %3969 = sst [smem:[#allocation14_spill]] %s3961_s0 }
   0x2   :  { %8 = vsyncpa [#allocation4], 0 }
   0x3   :  { %10 = vsyncpa [#allocation4 + $0x1], 0 }
   0x4   :  { %11 = vsyncpa [#allocation7], 0 }
   0x5   :  { %13 = vsyncpa [#allocation7 + $0x1], 0 }
   0x6   :  { %14 = vsyncpa [#allocation5], 0  ;;  %s3444_s12 = smov 0   ;;  %s3446_s13 = smov 0  }
   0x7   :  { %s3448_s14 = smov 0   ;;  %s3450_s15 = smov 0  }
   0x8   :  { %s3452_s16 = smov 0   ;;  %s3454_s17 = smov 0  }
   0x9 LB: > { %s3473_s18 = sadd.s32 4294967295, %s3410_s17   ;;  %s48_s19 = sadd.s32 1, %s3398_s14  ;;  %s3410_s17 = sphi %s3454_s17, %s20_s17   ;;  %s3406_s16 = sphi %s3452_s16, %s3984_s16   ;;  %s3402_s15 = sphi %s3450_s15, %s3983_s15   ;;  %s3398_s14 = sphi %s3448_s14, %s3982_s14   ;;  %s3394_s13 = sphi %s3446_s13, %s3981_s13   ;;  %s3390_s12 = sphi %s3444_s12, %s3980_s12  }
   0xa   : > { %p55_p0 = scmp.ne.s32.totalorder %s3398_s14, %s3394_s13  ;;  %p56_p1 = scmp.eq.s32.totalorder %s3410_s17, 0 }
   0xb   : > { %p61_p2 = scmp.ne.s32.totalorder %s3394_s13, %s3390_s12  ;;  %p3965_p3 = scmp.eq.s32.totalorder %s3473_s18, 0 }
   0xc   : > { %p57_p4 = por %p56_p1, %p55_p0  ;;  %p2445_p5 = scmp.ge.s32.totalorder %s3410_s17, 1 }
   0xd   : > { %p3484_p6 = por %p3965_p3, %p61_p2  ;;  %p154_p7 = scmp.lt.s32.totalorder %s3410_s17, 5 }
   0xe   : > { %s3412_s22 = smov [#allocation8]   ;;  %p2788_p10 = scmp.lt.s32.totalorder %s3410_s17, 4 }
   0xf   : > { %s3970_s20 = scalar_select %p3484_p6, 1, 0 }
  0x10   : > { %p3489_p8 = pnand %p2445_p5, %p154_p7  ;;  %s170_s23 = sshll.u32 %s3412_s22, 4  ;;  %s171_s23 = int_to_ptr.vmem [resolvable:$true] %s170_s23 }
  0x11   : > { %s3497_s24 = sand.u32 1, %s3398_s14   ;;  %p3505_p12 = pnand %p2788_p10, %p57_p4 }
  0x12   : > { %s3971_s21 = scalar_select %p3489_p8, 1, 0 }
  0x13   : > { %p2776_p9 = pneg %p3489_p8  ;;  %s3234_s29 = scalar_lea.hbm %s3963_s2, 64 }
  0x14   : > { %s3973_s26 = scalar_select %p3505_p12, 1, 0 }
  0x15   : > { %p3501_p11 = pnand %p2776_p9, %p3965_p3  ;;  %p3235_p13 = scmp.ne.s32.totalorder %s3963_s2, %s3234_s29 }
  0x16   : > { %p3241_p5 = scmp.lt.u32.totalorder %s3234_s29, %s3963_s2 }
  0x17   : > { %p3236_p0 = pneg %p3501_p11 }
  0x19   : > { %p3237_p1 = pnand %p3236_p0, %p3235_p13 }
  0x1b   : > { %p3238_p2 = pneg %p3237_p1 }
  0x1d   : > { %p3243_p4 = pnand %p3241_p5, %p3238_p2 }
  0x1f   : > { %3246 = shalt.err (!%p3243_p4)
}
  0x20   : > { %s3247_s7 = scalar_lea.vmem %s171_s23, 64  ;;  %p3255_p3 = scmp.lt.s32.totalorder %s171_s23, %s171_s23 }
  0x21   : > { %p3248_p7 = scmp.ne.s32.totalorder %s171_s23, %s3247_s7  ;;  %p3256_p6 = scmp.lt.s32.totalorder %s3247_s7, %s3247_s7 }
  0x23   : > { %p3250_p9 = pnand %p3248_p7, %p3236_p0  ;;  %p3257_p8 = por %p3256_p6, %p3255_p3 }
  0x25   : > { %p3251_p10 = pneg %p3250_p9 }
  0x27   : > { %p3258_p12 = pnand %p3257_p8, %p3251_p10 }
  0x29   : > { %3261 = shalt.err (!%p3258_p12)
}
  0x2a   : > { %2779 = dma.hbm_to_vmem [thread:$0]  (!%p3501_p11), %s3963_s2, 64, %s171_s23, [#allocation7]  }
  0x2b   : > { %s32_s10 = sadd.s32 1, %s3406_s16  ;;  %s2448_s11 = sshll.u32 %s3497_s24, 6 }
  0x2c   : > { %p33_p3 = scmp.ge.s32.totalorder %s32_s10, 4  ;;  %s2733_s12 = sshll.u32 %s3406_s16, 9 }
  0x2d   : > { %s185_s22 = scalar_lea.vmem [#allocation3], %s2448_s11  ;;  %s3974_s0 = sld [smem:[#allocation14_spill]] }
  0x2e   : > { %s195_s25 = sshll.u32 %s185_s22, 4  ;;  %s3986_s10 = smov (%p33_p3, %s32_s10), 0  ;;  %s3535_s25 = int_to_ptr.vmem [resolvable:$true] %s195_s25 }
  0x2f   : > { %s44_s23 = ssub.s32 %s3406_s16, %s3986_s10  ;;  %s205_s30 = sand.u32 1, %s3410_s17  }
  0x30   : > { %p46_p6 = scmp.eq.s32.totalorder %s44_s23, 0  ;;  %s182_s5 = scalar_lea.sflag [#allocation4], %s3497_s24 }
  0x31   : > { %p3975_p11 = scmp.ne.s32.totalorder %s3973_s26, 0 }
  0x32   : > { %s3543_s4 = scalar_select %p46_p6, %s3398_s14, %s48_s19  }
  0x33   : > { %s3533_s29 = scalar_lea.hbm %s3974_s0, %s2733_s12  ;;  %p3264_p12 = pneg %p3975_p11 }
  0x34   : > { %s3262_s6 = scalar_lea.hbm %s3533_s29, 1024  ;;  %s3267_s9 = scalar_lea.hbm %s3974_s0, 4096 }
  0x35   : > { %p3263_p8 = scmp.ne.s32.totalorder %s3533_s29, %s3262_s6  ;;  %p3268_p1 = scmp.lt.u32.totalorder %s3533_s29, %s3974_s0 }
  0x36   : > { %p3269_p2 = scmp.lt.u32.totalorder %s3267_s9, %s3262_s6  ;;  %p3271_p4 = scmp.lt.u32.totalorder %s3262_s6, %s3533_s29 }
  0x37   : > { %p3265_p13 = pnand %p3264_p12, %p3263_p8 }
  0x38   : > { %p3270_p5 = por %p3269_p2, %p3268_p1 }
  0x39   : > { %p3266_p0 = pneg %p3265_p13 }
  0x3a   : > { %p3272_p7 = por %p3271_p4, %p3270_p5 }
  0x3c   : > { %p3273_p9 = pnand %p3272_p7, %p3266_p0 }
  0x3e   : > { %3276 = shalt.err (!%p3273_p9)
}
  0x3f   : > { %s3277_s19 = scalar_lea.vmem %s3535_s25, 1024  ;;  %s3413_s22 = smov [#allocation3]  }
  0x40   : > { %p3278_p10 = scmp.ne.s32.totalorder %s3535_s25, %s3277_s19  ;;  %s3282_s27 = sshll.u32 %s3413_s22, 4  ;;  %s3283_s27 = int_to_ptr.vmem [resolvable:$false] %s3282_s27 }
  0x41   : > { %s3284_s28 = scalar_lea.vmem %s3283_s27, 2048  ;;  %p3285_p8 = scmp.lt.s32.totalorder %s3535_s25, %s3283_s27 }
  0x42   : > { %p3280_p3 = pnand %p3278_p10, %p3264_p12  ;;  %p3286_p13 = scmp.lt.s32.totalorder %s3284_s28, %s3277_s19 }
  0x44   : > { %p3281_p6 = pneg %p3280_p3  ;;  %p3287_p1 = por %p3286_p13, %p3285_p8 }
  0x46   : > { %p3288_p2 = pnand %p3287_p1, %p3281_p6 }
  0x48   : > { %3291 = shalt.err (!%p3288_p2)
}
  0x49   : > { %s3414_s23 = smov 2048   ;;  %s3415_s6 = smov 512  }
  0x4a   : > { %s3416_s7 = smov 32   ;;  %s2451_s8 = sshll.u32 %s3497_s24, 11 }
  0x4b   : > { %2783 = dma.hbm_to_vmem [thread:$0]  (!%p3975_p11), %s3533_s29, 1024, %s3535_s25, %s182_s5, %s3414_s23, %s3415_s6, %s3416_s7  }
  0x4c   : > { %s2735_s9 = sshll.u32 %s3406_s16, 15  ;;  %s209_s22 = scalar_lea.vmem [#allocation6], %s2451_s8 }
  0x4d   : > { %s3578_s19 = scalar_lea.hbm %s3962_s1, %s2735_s9  ;;  %s219_s27 = sshll.u32 %s209_s22, 4  ;;  %s3580_s27 = int_to_ptr.vmem [resolvable:$true] %s219_s27 }
  0x4e   : > { %s3584_s28 = scalar_lea.sflag [#allocation7], %s205_s30  ;;  %s3292_s0 = scalar_lea.hbm %s3578_s19, 32768 }
  0x4f   : > { %p3293_p0 = scmp.ne.s32.totalorder %s3578_s19, %s3292_s0  ;;  %s3297_s29 = scalar_lea.hbm %s3962_s1, 131072 }
  0x50   : > { %p3298_p7 = scmp.lt.u32.totalorder %s3578_s19, %s3962_s1  ;;  %p3299_p9 = scmp.lt.u32.totalorder %s3297_s29, %s3292_s0 }
  0x51   : > { %p3295_p5 = pnand %p3293_p0, %p3264_p12  ;;  %p3301_p3 = scmp.lt.u32.totalorder %s3292_s0, %s3578_s19 }
  0x52   : > { %p3300_p10 = por %p3299_p9, %p3298_p7 }
  0x53   : > { %p3296_p4 = pneg %p3295_p5 }
  0x54   : > { %p3302_p6 = por %p3301_p3, %p3300_p10 }
  0x56   : > { %p3303_p8 = pnand %p3302_p6, %p3296_p4 }
  0x58   : > { %3306 = shalt.err (!%p3303_p8)
}
  0x59   : > { %s3307_s30 = scalar_lea.vmem %s3580_s27, 32768  ;;  %s3417_s6 = smov [#allocation6]  }
  0x5a   : > { %p3308_p13 = scmp.ne.s32.totalorder %s3580_s27, %s3307_s30  ;;  %s3312_s7 = sshll.u32 %s3417_s6, 4  ;;  %s3313_s7 = int_to_ptr.vmem [resolvable:$false] %s3312_s7 }
  0x5b   : > { %s3314_s8 = scalar_lea.vmem %s3313_s7, 65536  ;;  %p3315_p0 = scmp.lt.s32.totalorder %s3580_s27, %s3313_s7 }
  0x5c   : > { %p3310_p1 = pnand %p3308_p13, %p3264_p12  ;;  %p3316_p5 = scmp.lt.s32.totalorder %s3314_s8, %s3307_s30 }
  0x5e   : > { %p3311_p2 = pneg %p3310_p1  ;;  %p3317_p7 = por %p3316_p5, %p3315_p0 }
  0x60   : > { %p3318_p9 = pnand %p3317_p7, %p3311_p2 }
  0x62   : > { %3321 = shalt.err (!%p3318_p9)
}
  0x63   : > { %s3418_s0 = smov 256   ;;  %s3419_s9 = smov 16  }
  0x64   : > { %2786 = dma.hbm_to_vmem [thread:$0]  (!%p3975_p11), %s3578_s19, 32768, %s3580_s27, %s3584_s28, %s3418_s0, %s3418_s0, %s3419_s9  }
  0x65   : > { %p3976_p12 = scmp.ne.s32.totalorder %s3971_s21, 0 }
  0x66   : > { %s233_s11 = sand.u32 (!%p3976_p12), 1, %s3394_s13   ;;  %p3977_p4 = scmp.ne.s32.totalorder (!%p3976_p12), %s3970_s20, 0 }
  0x67   : > { %231 = sbr.rel (%p3976_p12) target bundleno = 641 (0x281), region = 32  ;;  %s2456_s12 = sshll.u32 (!%p3976_p12), %s233_s11, 6 }
  0x68   : > { %s234_s22 = scalar_lea.sflag (!%p3976_p12), [#allocation4], %s233_s11  ;;  %s3613_s24 = scalar_lea.vmem (!%p3976_p12), [#allocation3], %s2456_s12 }
  0x6e   : > { %3373 = dma.done.wait (%p3977_p4), %s234_s22, 1024  }
  0x6f   : > { %3375 = vsyncadd (%p3977_p4), %s234_s22, 4294966272  ;;  %s242_s25 = sand.u32 1, %s3473_s18   ;;  %s2457_s26 = sshll.u32 %s233_s11, 11 }
  0x70   : > { %s243_s19 = scalar_lea.sflag [#allocation7], %s242_s25  ;;  %s3620_s27 = scalar_lea.vmem [#allocation6], %s2457_s26 }
  0x71   : > { %3377 = dma.done.wait (%p3977_p4), %s243_s19, 32768  }
  0x72   : > { %3379 = vsyncadd (%p3977_p4), %s243_s19, 4294934528  ;;  %p3978_p11 = scmp.eq.s32.totalorder %s3473_s18, 0 }
  0x74   : > { %3381 = dma.done.wait (%p3978_p11), [#allocation7], 64   ;;  %p3979_p10 = pmov %p3978_p11 }
  0x75   : > { %p2459_p3 = scmp.ne.s32.totalorder %s3402_s15, 0 }
  0x76   : > { %3383 = vsyncadd (%p3979_p10), [#allocation7], 4294967232  ;;  %v3420_v0 = vmov (!%p2459_p3), 0.0  }
  0x77   : > { %283 = sbr.rel (%p2459_p3) target bundleno = 126 (0x7e), region = 48  ;;  %284 = vst [vmem:[#allocation2] sm:$0xff] (!%p2459_p3), %v3420_v0  ;;  %285 = vst [vmem:[#allocation2 + $0x8] sm:$0xff] (!%p2459_p3), %v3420_v0 }
  0x78   : > { %286 = vst [vmem:[#allocation2 + $0x10] sm:$0xff] (!%p2459_p3), %v3420_v0  ;;  %287 = vst [vmem:[#allocation2 + $0x18] sm:$0xff] (!%p2459_p3), %v3420_v0 }
  0x79   : > { %288 = vst [vmem:[#allocation2 + $0x20] sm:$0xff] (!%p2459_p3), %v3420_v0  ;;  %289 = vst [vmem:[#allocation2 + $0x28] sm:$0xff] (!%p2459_p3), %v3420_v0 }
  0x7a   : > { %290 = vst [vmem:[#allocation2 + $0x30] sm:$0xff] (!%p2459_p3), %v3420_v0  ;;  %291 = vst [vmem:[#allocation2 + $0x38] sm:$0xff] (!%p2459_p3), %v3420_v0 }
  0x7e PF: > { %v2850_v1 = vld [vmem:[%s3620_s27 + $0x4] ss:$16 sps:$4 sm:$0xff]   ;;  %v2852_v2 = vld [vmem:[%s3620_s27 + $0xc] ss:$16 sps:$4 sm:$0xff]   ;;  %v2854_v3 = vld [vmem:[%s3620_s27] ss:$16 sps:$4 sm:$0xff]  }
  0x7f   : > { %1884 = vmatprep.subr.bf16.mxu0 %v2850_v1  ;;  %v2855_v4 = vld [vmem:[%s3620_s27 + $0x8] ss:$16 sps:$4 sm:$0xff]   ;;  %2056 = vmatprep.subr.bf16.mxu1 %v2852_v2  ;;  %v2856_v5 = vld [vmem:[%s3620_s27 + $0x24] ss:$16 sps:$4 sm:$0xff]   ;;  %v2858_v6 = vld [vmem:[%s3620_s27 + $0x2c] ss:$16 sps:$4 sm:$0xff]  }
  0x80   : > { %1885 = vmatpush1.bf16.msra.mxu0 %v2854_v3  ;;  %2057 = vmatpush1.bf16.msra.mxu1 %v2855_v4  ;;  %v2860_v7 = vld [vmem:[%s3620_s27 + $0x20] ss:$16 sps:$4 sm:$0xff]   ;;  %v2861_v8 = vld [vmem:[%s3620_s27 + $0x28] ss:$16 sps:$4 sm:$0xff]   ;;  %v2862_v9 = vld [vmem:[%s3620_s27 + $0x44] ss:$16 sps:$4 sm:$0xff]  }
  0x81   : > { %1886 = vmatprep.subr.bf16.mxu0 %v2856_v5  ;;  %2058 = vmatprep.subr.bf16.mxu1 %v2858_v6  ;;  %v2864_v10 = vld [vmem:[%s3620_s27 + $0x4c] ss:$16 sps:$4 sm:$0xff]   ;;  %v2866_v11 = vld [vmem:[%s3620_s27 + $0x40] ss:$16 sps:$4 sm:$0xff]   ;;  %v2867_v12 = vld [vmem:[%s3620_s27 + $0x48] ss:$16 sps:$4 sm:$0xff]  }
  0x82   : > { %v2868_v13 = vld [vmem:[%s3620_s27 + $0x64] ss:$16 sps:$4 sm:$0xff]   ;;  %v2870_v14 = vld [vmem:[%s3620_s27 + $0x6c] ss:$16 sps:$4 sm:$0xff]   ;;  %v2872_v15 = vld [vmem:[%s3620_s27 + $0x60] ss:$16 sps:$4 sm:$0xff]  }
  0x83   : > { %v2873_v16 = vld [vmem:[%s3620_s27 + $0x68] ss:$16 sps:$4 sm:$0xff]   ;;  %v2874_v17 = vld [vmem:[%s3620_s27 + $0x84] ss:$16 sps:$4 sm:$0xff]   ;;  %v2876_v18 = vld [vmem:[%s3620_s27 + $0x8c] ss:$16 sps:$4 sm:$0xff]  }
  0x84   : > { %1887 = vmatpush1.bf16.msra.mxu0 %v2860_v7  ;;  %2059 = vmatpush1.bf16.msra.mxu1 %v2861_v8  ;;  %v2878_v19 = vld [vmem:[%s3620_s27 + $0x80] ss:$16 sps:$4 sm:$0xff]   ;;  %v2879_v20 = vld [vmem:[%s3620_s27 + $0x88] ss:$16 sps:$4 sm:$0xff]   ;;  %v2880_v21 = vld [vmem:[%s3620_s27 + $0xa4] ss:$16 sps:$4 sm:$0xff]  }
  0x85   : > { %1888 = vmatprep.subr.bf16.mxu0 %v2862_v9  ;;  %2060 = vmatprep.subr.bf16.mxu1 %v2864_v10  ;;  %v2882_v22 = vld [vmem:[%s3620_s27 + $0xac] ss:$16 sps:$4 sm:$0xff]   ;;  %v2884_v23 = vld [vmem:[%s3620_s27 + $0xa0] ss:$16 sps:$4 sm:$0xff]   ;;  %v2885_v24 = vld [vmem:[%s3620_s27 + $0xa8] ss:$16 sps:$4 sm:$0xff]  }
  0x86   : > { %v2886_v25 = vld [vmem:[%s3620_s27 + $0xc4] ss:$16 sps:$4 sm:$0xff]   ;;  %v2888_v26 = vld [vmem:[%s3620_s27 + $0xcc] ss:$16 sps:$4 sm:$0xff]   ;;  %v2890_v27 = vld [vmem:[%s3620_s27 + $0xc0] ss:$16 sps:$4 sm:$0xff]  }
  0x87   : > { %v2891_v28 = vld [vmem:[%s3620_s27 + $0xc8] ss:$16 sps:$4 sm:$0xff]   ;;  %v2892_v29 = vld [vmem:[%s3620_s27 + $0xe4] ss:$16 sps:$4 sm:$0xff]   ;;  %v2894_v30 = vld [vmem:[%s3620_s27 + $0xec] ss:$16 sps:$4 sm:$0xff]  }
  0x88   : > { %1889 = vmatpush1.bf16.msra.mxu0 %v2866_v11  ;;  %2061 = vmatpush1.bf16.msra.mxu1 %v2867_v12  ;;  %v2896_v31 = vld [vmem:[%s3620_s27 + $0xe0] ss:$16 sps:$4 sm:$0xff]   ;;  %v2897_v32 = vld [vmem:[%s3620_s27 + $0xe8] ss:$16 sps:$4 sm:$0xff]   ;;  %v2898_v33 = vld [vmem:[%s3620_s27 + $0x104] ss:$16 sps:$4 sm:$0xff]  }
  0x89   : > { %1890 = vmatprep.subr.bf16.mxu0 %v2868_v13  ;;  %2062 = vmatprep.subr.bf16.mxu1 %v2870_v14  ;;  %v2900_v34 = vld [vmem:[%s3620_s27 + $0x10c] ss:$16 sps:$4 sm:$0xff]   ;;  %v2902_v35 = vld [vmem:[%s3620_s27 + $0x100] ss:$16 sps:$4 sm:$0xff]   ;;  %v2903_v36 = vld [vmem:[%s3620_s27 + $0x108] ss:$16 sps:$4 sm:$0xff]  }
  0x8a   : > { %v2904_v37 = vld [vmem:[%s3620_s27 + $0x124] ss:$16 sps:$4 sm:$0xff]   ;;  %v2906_v38 = vld [vmem:[%s3620_s27 + $0x12c] ss:$16 sps:$4 sm:$0xff]   ;;  %v2908_v39 = vld [vmem:[%s3620_s27 + $0x120] ss:$16 sps:$4 sm:$0xff]  }
  0x8b   : > { %v2909_v40 = vld [vmem:[%s3620_s27 + $0x128] ss:$16 sps:$4 sm:$0xff]   ;;  %v2910_v41 = vld [vmem:[%s3620_s27 + $0x144] ss:$16 sps:$4 sm:$0xff]   ;;  %v2912_v42 = vld [vmem:[%s3620_s27 + $0x14c] ss:$16 sps:$4 sm:$0xff]  }
  0x8c   : > { %1891 = vmatpush1.bf16.msra.mxu0 %v2872_v15  ;;  %2063 = vmatpush1.bf16.msra.mxu1 %v2873_v16  ;;  %v2914_v43 = vld [vmem:[%s3620_s27 + $0x140] ss:$16 sps:$4 sm:$0xff]   ;;  %v2915_v44 = vld [vmem:[%s3620_s27 + $0x148] ss:$16 sps:$4 sm:$0xff]   ;;  %v2916_v45 = vld [vmem:[%s3620_s27 + $0x164] ss:$16 sps:$4 sm:$0xff]  }
  0x8d   : > { %1892 = vmatprep.subr.bf16.mxu0 %v2874_v17  ;;  %2064 = vmatprep.subr.bf16.mxu1 %v2876_v18  ;;  %v2918_v46 = vld [vmem:[%s3620_s27 + $0x16c] ss:$16 sps:$4 sm:$0xff]   ;;  %v300_v47 = vld [vmem:[%s3613_s24] sm:$0xff]  ;;  %v2921_v50 = vld [vmem:[%s3620_s27 + $0x168] ss:$16 sps:$4 sm:$0xff]   ;;  %p2724_p6 = scmp.ne.s32.totalorder %s3402_s15, 3 }
  0x8e   : > { %v304_v48 = vld [vmem:[%s3613_s24 + $0x20] sm:$0xff]  ;;  %v2924_v53 = vld [vmem:[%s3620_s27 + $0x18c] ss:$16 sps:$4 sm:$0xff]   ;;  %v2927_v55 = vld [vmem:[%s3620_s27 + $0x188] ss:$16 sps:$4 sm:$0xff]  }
  0x8f   : > { %v2920_v49 = vld [vmem:[%s3620_s27 + $0x160] ss:$16 sps:$4 sm:$0xff]   ;;  %v2461_v51 = vcombine.high %v300_v47, %v304_v48  ;;  %v2922_v52 = vld [vmem:[%s3620_s27 + $0x184] ss:$16 sps:$4 sm:$0xff]   ;;  %v2930_v57 = vld [vmem:[%s3620_s27 + $0x1ac] ss:$16 sps:$4 sm:$0xff]   ;;  %v2460_v6 = vcombine.low %v300_v47, %v304_v48 }
  0x90   : > { %1893 = vmatpush1.bf16.msra.mxu0 %v2878_v19  ;;  %2065 = vmatpush1.bf16.msra.mxu1 %v2879_v20  ;;  %v2926_v54 = vld [vmem:[%s3620_s27 + $0x180] ss:$16 sps:$4 sm:$0xff]   ;;  %v2928_v56 = vld [vmem:[%s3620_s27 + $0x1a4] ss:$16 sps:$4 sm:$0xff]   ;;  %v2933_v59 = vld [vmem:[%s3620_s27 + $0x1a8] ss:$16 sps:$4 sm:$0xff]  }
  0x91   : > { %1894 = vmatprep.subr.bf16.mxu0 %v2880_v21  ;;  %2066 = vmatprep.subr.bf16.mxu1 %v2882_v22  ;;  %v2932_v58 = vld [vmem:[%s3620_s27 + $0x1a0] ss:$16 sps:$4 sm:$0xff]   ;;  %v2934_v60 = vld [vmem:[%s3620_s27 + $0x1c4] ss:$16 sps:$4 sm:$0xff]   ;;  %v2936_v61 = vld [vmem:[%s3620_s27 + $0x1cc] ss:$16 sps:$4 sm:$0xff]  }
  0x92   : > { %1916 = vmatprep.mubr.bf16.mxu0 %v2461_v51  ;;  %2088 = vmatprep.mubr.bf16.mxu1 %v2461_v51  ;;  %v2938_v62 = vld [vmem:[%s3620_s27 + $0x1c0] ss:$16 sps:$4 sm:$0xff]   ;;  %v2939_v63 = vld [vmem:[%s3620_s27 + $0x1c8] ss:$16 sps:$4 sm:$0xff]   ;;  %v2940_v0 = vld [vmem:[%s3620_s27 + $0x1e4] ss:$16 sps:$4 sm:$0xff]  }
  0x93   : > { %v2942_v1 = vld [vmem:[%s3620_s27 + $0x1ec] ss:$16 sps:$4 sm:$0xff]   ;;  %v2944_v2 = vld [vmem:[%s3620_s27 + $0x1e0] ss:$16 sps:$4 sm:$0xff]   ;;  %v2945_v3 = vld [vmem:[%s3620_s27 + $0x1e8] ss:$16 sps:$4 sm:$0xff]  }
  0x94   : > { %1895 = vmatpush1.bf16.msra.mxu0 %v2884_v23  ;;  %2067 = vmatpush1.bf16.msra.mxu1 %v2885_v24  ;;  %v2948_v4 = vld [vmem:[%s3620_s27 + $0x204] ss:$16 sps:$4 sm:$0xff]   ;;  %v2951_v5 = vld [vmem:[%s3620_s27 + $0x20c] ss:$16 sps:$4 sm:$0xff]   ;;  %v2946_v7 = vld [vmem:[%s3620_s27 + $0x200] ss:$16 sps:$4 sm:$0xff]  }
  0x95   : > { %1896 = vmatprep.subr.bf16.mxu0 %v2886_v25  ;;  %2068 = vmatprep.subr.bf16.mxu1 %v2888_v26  ;;  %v2949_v8 = vld [vmem:[%s3620_s27 + $0x208] ss:$16 sps:$4 sm:$0xff]   ;;  %v2954_v9 = vld [vmem:[%s3620_s27 + $0x224] ss:$16 sps:$4 sm:$0xff]   ;;  %v2957_v10 = vld [vmem:[%s3620_s27 + $0x22c] ss:$16 sps:$4 sm:$0xff]  }
  0x96   : > { %v2952_v11 = vld [vmem:[%s3620_s27 + $0x220] ss:$16 sps:$4 sm:$0xff]   ;;  %v2955_v12 = vld [vmem:[%s3620_s27 + $0x228] ss:$16 sps:$4 sm:$0xff]   ;;  %v2960_v13 = vld [vmem:[%s3620_s27 + $0x244] ss:$16 sps:$4 sm:$0xff]  }
  0x97   : > { %v2963_v14 = vld [vmem:[%s3620_s27 + $0x24c] ss:$16 sps:$4 sm:$0xff]   ;;  %v2958_v15 = vld [vmem:[%s3620_s27 + $0x240] ss:$16 sps:$4 sm:$0xff]   ;;  %v2961_v16 = vld [vmem:[%s3620_s27 + $0x248] ss:$16 sps:$4 sm:$0xff]  }
  0x98   : > { %1897 = vmatpush1.bf16.msra.mxu0 %v2890_v27  ;;  %2069 = vmatpush1.bf16.msra.mxu1 %v2891_v28  ;;  %v2966_v17 = vld [vmem:[%s3620_s27 + $0x264] ss:$16 sps:$4 sm:$0xff]   ;;  %v2969_v18 = vld [vmem:[%s3620_s27 + $0x26c] ss:$16 sps:$4 sm:$0xff]   ;;  %v2964_v19 = vld [vmem:[%s3620_s27 + $0x260] ss:$16 sps:$4 sm:$0xff]  }
  0x99   : > { %1898 = vmatprep.subr.bf16.mxu0 %v2892_v29  ;;  %2070 = vmatprep.subr.bf16.mxu1 %v2894_v30  ;;  %v2967_v20 = vld [vmem:[%s3620_s27 + $0x268] ss:$16 sps:$4 sm:$0xff]   ;;  %v2972_v21 = vld [vmem:[%s3620_s27 + $0x284] ss:$16 sps:$4 sm:$0xff]   ;;  %v2975_v22 = vld [vmem:[%s3620_s27 + $0x28c] ss:$16 sps:$4 sm:$0xff]  }
  0x9a   : > { %v2970_v23 = vld [vmem:[%s3620_s27 + $0x280] ss:$16 sps:$4 sm:$0xff]   ;;  %v2973_v24 = vld [vmem:[%s3620_s27 + $0x288] ss:$16 sps:$4 sm:$0xff]   ;;  %v2978_v25 = vld [vmem:[%s3620_s27 + $0x2a4] ss:$16 sps:$4 sm:$0xff]  }
  0x9b   : > { %v2981_v26 = vld [vmem:[%s3620_s27 + $0x2ac] ss:$16 sps:$4 sm:$0xff]   ;;  %v2976_v27 = vld [vmem:[%s3620_s27 + $0x2a0] ss:$16 sps:$4 sm:$0xff]   ;;  %v2979_v28 = vld [vmem:[%s3620_s27 + $0x2a8] ss:$16 sps:$4 sm:$0xff]  }
  0x9c   : > { %1899 = vmatpush1.bf16.msra.mxu0 %v2896_v31  ;;  %2071 = vmatpush1.bf16.msra.mxu1 %v2897_v32  ;;  %v2984_v29 = vld [vmem:[%s3620_s27 + $0x2c4] ss:$16 sps:$4 sm:$0xff]   ;;  %v2987_v30 = vld [vmem:[%s3620_s27 + $0x2cc] ss:$16 sps:$4 sm:$0xff]   ;;  %v3003_v47 = vld [vmem:[%s3620_s27 + $0x328] ss:$16 sps:$4 sm:$0xff]  }
  0x9d   : > { %1900 = vmatprep.subr.bf16.mxu0 %v2898_v33  ;;  %2072 = vmatprep.subr.bf16.mxu1 %v2900_v34  ;;  %v3724_v31 = vld [vmem:[%s3613_s24 + $0x8] sm:$0xff]  ;;  %v2982_v33 = vld [vmem:[%s3620_s27 + $0x2c0] ss:$16 sps:$4 sm:$0xff]   ;;  %v3008_v48 = vld [vmem:[%s3620_s27 + $0x344] ss:$16 sps:$4 sm:$0xff]  }
  0x9e   : > { %v3727_v32 = vld [vmem:[%s3613_s24 + $0x28] sm:$0xff] }
  0x9f   : > { %v2985_v34 = vld [vmem:[%s3620_s27 + $0x2c8] ss:$16 sps:$4 sm:$0xff]  }
  0xa0   : > { %1901 = vmatpush1.bf16.msra.mxu0 %v2902_v35  ;;  %2073 = vmatpush1.bf16.msra.mxu1 %v2903_v36  ;;  %v2463_v35 = vcombine.high %v3724_v31, %v3727_v32  ;;  %v2990_v36 = vld [vmem:[%s3620_s27 + $0x2e4] ss:$16 sps:$4 sm:$0xff]   ;;  %v3009_v51 = vld [vmem:[%s3620_s27 + $0x348] ss:$16 sps:$4 sm:$0xff]  }
  0xa1   : > { %1902 = vmatprep.subr.bf16.mxu0 %v2904_v37  ;;  %2074 = vmatprep.subr.bf16.mxu1 %v2906_v38  ;;  %v2993_v37 = vld [vmem:[%s3620_s27 + $0x2ec] ss:$16 sps:$4 sm:$0xff]   ;;  %v2988_v38 = vld [vmem:[%s3620_s27 + $0x2e0] ss:$16 sps:$4 sm:$0xff]  }
  0xa4   : > { %1903 = vmatpush1.bf16.msra.mxu0 %v2908_v39  ;;  %2075 = vmatpush1.bf16.msra.mxu1 %v2909_v40  ;;  %v2991_v39 = vld [vmem:[%s3620_s27 + $0x2e8] ss:$16 sps:$4 sm:$0xff]   ;;  %v2996_v40 = vld [vmem:[%s3620_s27 + $0x304] ss:$16 sps:$4 sm:$0xff]  }
  0xa5   : > { %1904 = vmatprep.subr.bf16.mxu0 %v2910_v41  ;;  %2076 = vmatprep.subr.bf16.mxu1 %v2912_v42  ;;  %v2999_v41 = vld [vmem:[%s3620_s27 + $0x30c] ss:$16 sps:$4 sm:$0xff]   ;;  %v2994_v42 = vld [vmem:[%s3620_s27 + $0x300] ss:$16 sps:$4 sm:$0xff]  }
  0xa8   : > { %1905 = vmatpush1.bf16.msra.mxu0 %v2914_v43  ;;  %2077 = vmatpush1.bf16.msra.mxu1 %v2915_v44  ;;  %v2997_v43 = vld [vmem:[%s3620_s27 + $0x308] ss:$16 sps:$4 sm:$0xff]   ;;  %v3002_v44 = vld [vmem:[%s3620_s27 + $0x324] ss:$16 sps:$4 sm:$0xff]  }
  0xa9   : > { %1906 = vmatprep.subr.bf16.mxu0 %v2916_v45  ;;  %2078 = vmatprep.subr.bf16.mxu1 %v2918_v46  ;;  %v3005_v45 = vld [vmem:[%s3620_s27 + $0x32c] ss:$16 sps:$4 sm:$0xff]   ;;  %v3000_v46 = vld [vmem:[%s3620_s27 + $0x320] ss:$16 sps:$4 sm:$0xff]  }
  0xac   : > { %1907 = vmatpush1.bf16.msra.mxu0 %v2920_v49  ;;  %2079 = vmatpush1.bf16.msra.mxu1 %v2921_v50  ;;  %v3011_v49 = vld [vmem:[%s3620_s27 + $0x34c] ss:$16 sps:$4 sm:$0xff]   ;;  %v3006_v50 = vld [vmem:[%s3620_s27 + $0x340] ss:$16 sps:$4 sm:$0xff]  }
  0xad   : > { %1908 = vmatprep.subr.bf16.mxu0 %v2922_v52  ;;  %2080 = vmatprep.subr.bf16.mxu1 %v2924_v53  ;;  %v3014_v52 = vld [vmem:[%s3620_s27 + $0x364] ss:$16 sps:$4 sm:$0xff]   ;;  %v3017_v53 = vld [vmem:[%s3620_s27 + $0x36c] ss:$16 sps:$4 sm:$0xff]  }
  0xb0   : > { %1909 = vmatpush1.bf16.msra.mxu0 %v2926_v54  ;;  %2081 = vmatpush1.bf16.msra.mxu1 %v2927_v55  ;;  %v3012_v54 = vld [vmem:[%s3620_s27 + $0x360] ss:$16 sps:$4 sm:$0xff]   ;;  %v3015_v55 = vld [vmem:[%s3620_s27 + $0x368] ss:$16 sps:$4 sm:$0xff]  }
  0xb1   : > { %1910 = vmatprep.subr.bf16.mxu0 %v2928_v56  ;;  %2082 = vmatprep.subr.bf16.mxu1 %v2930_v57  ;;  %v3020_v56 = vld [vmem:[%s3620_s27 + $0x384] ss:$16 sps:$4 sm:$0xff]   ;;  %v3023_v57 = vld [vmem:[%s3620_s27 + $0x38c] ss:$16 sps:$4 sm:$0xff]  }
  0xb4   : > { %1911 = vmatpush1.bf16.msra.mxu0 %v2932_v58  ;;  %2083 = vmatpush1.bf16.msra.mxu1 %v2933_v59  ;;  %v3018_v58 = vld [vmem:[%s3620_s27 + $0x380] ss:$16 sps:$4 sm:$0xff]   ;;  %v3021_v59 = vld [vmem:[%s3620_s27 + $0x388] ss:$16 sps:$4 sm:$0xff]  }
  0xb5   : > { %1912 = vmatprep.subr.bf16.mxu0 %v2934_v60  ;;  %2084 = vmatprep.subr.bf16.mxu1 %v2936_v61  ;;  %v3026_v60 = vld [vmem:[%s3620_s27 + $0x3a4] ss:$16 sps:$4 sm:$0xff]   ;;  %v3029_v61 = vld [vmem:[%s3620_s27 + $0x3ac] ss:$16 sps:$4 sm:$0xff]  }
  0xb8   : > { %1913 = vmatpush1.bf16.msra.mxu0 %v2938_v62  ;;  %2085 = vmatpush1.bf16.msra.mxu1 %v2939_v63  ;;  %v3024_v62 = vld [vmem:[%s3620_s27 + $0x3a0] ss:$16 sps:$4 sm:$0xff]   ;;  %v3027_v63 = vld [vmem:[%s3620_s27 + $0x3a8] ss:$16 sps:$4 sm:$0xff]  }
  0xb9   : > { %1914 = vmatprep.subr.bf16.mxu0 %v2940_v0  ;;  %2086 = vmatprep.subr.bf16.mxu1 %v2942_v1  ;;  %v3032_v0 = vld [vmem:[%s3620_s27 + $0x3c4] ss:$16 sps:$4 sm:$0xff]   ;;  %v3035_v1 = vld [vmem:[%s3620_s27 + $0x3cc] ss:$16 sps:$4 sm:$0xff]  }
  0xbc   : > { %1915 = vmatpush1.bf16.msra.mxu0 %v2944_v2  ;;  %2087 = vmatpush1.bf16.msra.mxu1 %v2945_v3  ;;  %v3030_v2 = vld [vmem:[%s3620_s27 + $0x3c0] ss:$16 sps:$4 sm:$0xff]   ;;  %v3033_v3 = vld [vmem:[%s3620_s27 + $0x3c8] ss:$16 sps:$4 sm:$0xff]  }
  0xbd   : > { %1927 = vmatprep.subr.bf16.mxu0 %v2948_v4  ;;  %2099 = vmatprep.subr.bf16.mxu1 %v2951_v5  ;;  %v3038_v4 = vld [vmem:[%s3620_s27 + $0x3e4] ss:$16 sps:$4 sm:$0xff]   ;;  %v3041_v5 = vld [vmem:[%s3620_s27 + $0x3ec] ss:$16 sps:$4 sm:$0xff]  }
  0xbf   : > { %1917 = vmatmul.mubr.bf16.vlgmr.msra.gmra.mrb[0].mxu0 %v2460_v6  ;;  %2089 = vmatmul.mubr.bf16.vlgmr.msra.gmra.mrb[0].mxu1 %v2460_v6  ;;  %v3036_v6 = vld [vmem:[%s3620_s27 + $0x3e0] ss:$16 sps:$4 sm:$0xff]  }
  0xc0   : > { %1928 = vmatpush1.bf16.msra.mxu0 %v2946_v7  ;;  %2100 = vmatpush1.bf16.msra.mxu1 %v2949_v8  ;;  %v3039_v7 = vld [vmem:[%s3620_s27 + $0x3e8] ss:$16 sps:$4 sm:$0xff]   ;;  %v3044_v8 = vld [vmem:[%s3620_s27 + $0x404] ss:$16 sps:$4 sm:$0xff]  }
  0xc1   : > { %1929 = vmatprep.subr.bf16.mxu0 %v2954_v9  ;;  %2101 = vmatprep.subr.bf16.mxu1 %v2957_v10  ;;  %v3047_v9 = vld [vmem:[%s3620_s27 + $0x40c] ss:$16 sps:$4 sm:$0xff]   ;;  %v2462_v10 = vcombine.low %v3724_v31, %v3727_v32  ;;  %v3069_v31 = vld [vmem:[%s3620_s27 + $0x488] ss:$16 sps:$4 sm:$0xff]   ;;  %v3074_v32 = vld [vmem:[%s3620_s27 + $0x4a4] ss:$16 sps:$4 sm:$0xff]  }
  0xc2   : > { %1959 = vmatprep.mubr.bf16.mxu0 %v2463_v35  ;;  %2131 = vmatprep.mubr.bf16.mxu1 %v2463_v35  ;;  %v3075_v35 = vld [vmem:[%s3620_s27 + $0x4a8] ss:$16 sps:$4 sm:$0xff]  }
  0xc4   : > { %1930 = vmatpush1.bf16.msra.mxu0 %v2952_v11  ;;  %2102 = vmatpush1.bf16.msra.mxu1 %v2955_v12  ;;  %v3042_v11 = vld [vmem:[%s3620_s27 + $0x400] ss:$16 sps:$4 sm:$0xff]   ;;  %v3045_v12 = vld [vmem:[%s3620_s27 + $0x408] ss:$16 sps:$4 sm:$0xff]  }
  0xc5   : > { %1931 = vmatprep.subr.bf16.mxu0 %v2960_v13  ;;  %2103 = vmatprep.subr.bf16.mxu1 %v2963_v14  ;;  %v3050_v13 = vld [vmem:[%s3620_s27 + $0x424] ss:$16 sps:$4 sm:$0xff]   ;;  %v3053_v14 = vld [vmem:[%s3620_s27 + $0x42c] ss:$16 sps:$4 sm:$0xff]  }
  0xc8   : > { %1932 = vmatpush1.bf16.msra.mxu0 %v2958_v15  ;;  %2104 = vmatpush1.bf16.msra.mxu1 %v2961_v16  ;;  %v3778_v15 = vld [vmem:[%s3613_s24 + $0x10] sm:$0xff] }
  0xc9   : > { %1933 = vmatprep.subr.bf16.mxu0 %v2966_v17  ;;  %2105 = vmatprep.subr.bf16.mxu1 %v2969_v18  ;;  %v3781_v16 = vld [vmem:[%s3613_s24 + $0x30] sm:$0xff] }
  0xca   : > { %v2465_v17 = vcombine.high %v3778_v15, %v3781_v16  ;;  %v3048_v18 = vld [vmem:[%s3620_s27 + $0x420] ss:$16 sps:$4 sm:$0xff]  }
  0xcc   : > { %1934 = vmatpush1.bf16.msra.mxu0 %v2964_v19  ;;  %2106 = vmatpush1.bf16.msra.mxu1 %v2967_v20  ;;  %v3051_v19 = vld [vmem:[%s3620_s27 + $0x428] ss:$16 sps:$4 sm:$0xff]   ;;  %v3056_v20 = vld [vmem:[%s3620_s27 + $0x444] ss:$16 sps:$4 sm:$0xff]  }
  0xcd   : > { %1935 = vmatprep.subr.bf16.mxu0 %v2972_v21  ;;  %2107 = vmatprep.subr.bf16.mxu1 %v2975_v22  ;;  %v3059_v21 = vld [vmem:[%s3620_s27 + $0x44c] ss:$16 sps:$4 sm:$0xff]   ;;  %v3054_v22 = vld [vmem:[%s3620_s27 + $0x440] ss:$16 sps:$4 sm:$0xff]  }
  0xd0   : > { %1936 = vmatpush1.bf16.msra.mxu0 %v2970_v23  ;;  %2108 = vmatpush1.bf16.msra.mxu1 %v2973_v24  ;;  %v3057_v23 = vld [vmem:[%s3620_s27 + $0x448] ss:$16 sps:$4 sm:$0xff]   ;;  %v3062_v24 = vld [vmem:[%s3620_s27 + $0x464] ss:$16 sps:$4 sm:$0xff]  }
  0xd1   : > { %1937 = vmatprep.subr.bf16.mxu0 %v2978_v25  ;;  %2109 = vmatprep.subr.bf16.mxu1 %v2981_v26  ;;  %v3065_v25 = vld [vmem:[%s3620_s27 + $0x46c] ss:$16 sps:$4 sm:$0xff]   ;;  %v3060_v26 = vld [vmem:[%s3620_s27 + $0x460] ss:$16 sps:$4 sm:$0xff]  }
  0xd4   : > { %1938 = vmatpush1.bf16.msra.mxu0 %v2976_v27  ;;  %2110 = vmatpush1.bf16.msra.mxu1 %v2979_v28  ;;  %v3063_v27 = vld [vmem:[%s3620_s27 + $0x468] ss:$16 sps:$4 sm:$0xff]   ;;  %v3068_v28 = vld [vmem:[%s3620_s27 + $0x484] ss:$16 sps:$4 sm:$0xff]  }
  0xd5   : > { %1939 = vmatprep.subr.bf16.mxu0 %v2984_v29  ;;  %2111 = vmatprep.subr.bf16.mxu1 %v2987_v30  ;;  %v3071_v29 = vld [vmem:[%s3620_s27 + $0x48c] ss:$16 sps:$4 sm:$0xff]   ;;  %v3066_v30 = vld [vmem:[%s3620_s27 + $0x480] ss:$16 sps:$4 sm:$0xff]  }
  0xd8   : > { %1940 = vmatpush1.bf16.msra.mxu0 %v2982_v33  ;;  %2112 = vmatpush1.bf16.msra.mxu1 %v2985_v34  ;;  %v3077_v33 = vld [vmem:[%s3620_s27 + $0x4ac] ss:$16 sps:$4 sm:$0xff]   ;;  %v3072_v34 = vld [vmem:[%s3620_s27 + $0x4a0] ss:$16 sps:$4 sm:$0xff]  }
  0xd9   : > { %1941 = vmatprep.subr.bf16.mxu0 %v2990_v36  ;;  %2113 = vmatprep.subr.bf16.mxu1 %v2993_v37  ;;  %v3080_v36 = vld [vmem:[%s3620_s27 + $0x4c4] ss:$16 sps:$4 sm:$0xff]   ;;  %v3083_v37 = vld [vmem:[%s3620_s27 + $0x4cc] ss:$16 sps:$4 sm:$0xff]  }
  0xdc   : > { %1942 = vmatpush1.bf16.msra.mxu0 %v2988_v38  ;;  %2114 = vmatpush1.bf16.msra.mxu1 %v2991_v39  ;;  %v3078_v38 = vld [vmem:[%s3620_s27 + $0x4c0] ss:$16 sps:$4 sm:$0xff]   ;;  %v3081_v39 = vld [vmem:[%s3620_s27 + $0x4c8] ss:$16 sps:$4 sm:$0xff]  }
  0xdd   : > { %1943 = vmatprep.subr.bf16.mxu0 %v2996_v40  ;;  %2115 = vmatprep.subr.bf16.mxu1 %v2999_v41  ;;  %v3086_v40 = vld [vmem:[%s3620_s27 + $0x4e4] ss:$16 sps:$4 sm:$0xff]   ;;  %v3089_v41 = vld [vmem:[%s3620_s27 + $0x4ec] ss:$16 sps:$4 sm:$0xff]  }
  0xe0   : > { %1944 = vmatpush1.bf16.msra.mxu0 %v2994_v42  ;;  %2116 = vmatpush1.bf16.msra.mxu1 %v2997_v43  ;;  %v3084_v42 = vld [vmem:[%s3620_s27 + $0x4e0] ss:$16 sps:$4 sm:$0xff]   ;;  %v3087_v43 = vld [vmem:[%s3620_s27 + $0x4e8] ss:$16 sps:$4 sm:$0xff]  }
  0xe1   : > { %1945 = vmatprep.subr.bf16.mxu0 %v3002_v44  ;;  %2117 = vmatprep.subr.bf16.mxu1 %v3005_v45  ;;  %v3092_v44 = vld [vmem:[%s3620_s27 + $0x504] ss:$16 sps:$4 sm:$0xff]   ;;  %v3095_v45 = vld [vmem:[%s3620_s27 + $0x50c] ss:$16 sps:$4 sm:$0xff]  }
  0xe4   : > { %1946 = vmatpush1.bf16.msra.mxu0 %v3000_v46  ;;  %2118 = vmatpush1.bf16.msra.mxu1 %v3003_v47  ;;  %v3090_v46 = vld [vmem:[%s3620_s27 + $0x500] ss:$16 sps:$4 sm:$0xff]   ;;  %v3093_v47 = vld [vmem:[%s3620_s27 + $0x508] ss:$16 sps:$4 sm:$0xff]  }
  0xe5   : > { %1947 = vmatprep.subr.bf16.mxu0 %v3008_v48  ;;  %2119 = vmatprep.subr.bf16.mxu1 %v3011_v49  ;;  %v3098_v48 = vld [vmem:[%s3620_s27 + $0x524] ss:$16 sps:$4 sm:$0xff]   ;;  %v3101_v49 = vld [vmem:[%s3620_s27 + $0x52c] ss:$16 sps:$4 sm:$0xff]  }
  0xe8   : > { %1948 = vmatpush1.bf16.msra.mxu0 %v3006_v50  ;;  %2120 = vmatpush1.bf16.msra.mxu1 %v3009_v51  ;;  %v3096_v50 = vld [vmem:[%s3620_s27 + $0x520] ss:$16 sps:$4 sm:$0xff]   ;;  %v3099_v51 = vld [vmem:[%s3620_s27 + $0x528] ss:$16 sps:$4 sm:$0xff]  }
  0xe9   : > { %1949 = vmatprep.subr.bf16.mxu0 %v3014_v52  ;;  %2121 = vmatprep.subr.bf16.mxu1 %v3017_v53  ;;  %v3104_v52 = vld [vmem:[%s3620_s27 + $0x544] ss:$16 sps:$4 sm:$0xff]   ;;  %v3107_v53 = vld [vmem:[%s3620_s27 + $0x54c] ss:$16 sps:$4 sm:$0xff]  }
  0xec   : > { %1950 = vmatpush1.bf16.msra.mxu0 %v3012_v54  ;;  %2122 = vmatpush1.bf16.msra.mxu1 %v3015_v55  ;;  %v3102_v54 = vld [vmem:[%s3620_s27 + $0x540] ss:$16 sps:$4 sm:$0xff]   ;;  %v3105_v55 = vld [vmem:[%s3620_s27 + $0x548] ss:$16 sps:$4 sm:$0xff]  }
  0xed   : > { %1951 = vmatprep.subr.bf16.mxu0 %v3020_v56  ;;  %2123 = vmatprep.subr.bf16.mxu1 %v3023_v57  ;;  %v3110_v56 = vld [vmem:[%s3620_s27 + $0x564] ss:$16 sps:$4 sm:$0xff]   ;;  %v3113_v57 = vld [vmem:[%s3620_s27 + $0x56c] ss:$16 sps:$4 sm:$0xff]  }
  0xf0   : > { %1952 = vmatpush1.bf16.msra.mxu0 %v3018_v58  ;;  %2124 = vmatpush1.bf16.msra.mxu1 %v3021_v59  ;;  %v3108_v58 = vld [vmem:[%s3620_s27 + $0x560] ss:$16 sps:$4 sm:$0xff]   ;;  %v3111_v59 = vld [vmem:[%s3620_s27 + $0x568] ss:$16 sps:$4 sm:$0xff]  }
  0xf1   : > { %1953 = vmatprep.subr.bf16.mxu0 %v3026_v60  ;;  %2125 = vmatprep.subr.bf16.mxu1 %v3029_v61  ;;  %v3116_v60 = vld [vmem:[%s3620_s27 + $0x584] ss:$16 sps:$4 sm:$0xff]   ;;  %v3119_v61 = vld [vmem:[%s3620_s27 + $0x58c] ss:$16 sps:$4 sm:$0xff]  }
  0xf4   : > { %1954 = vmatpush1.bf16.msra.mxu0 %v3024_v62  ;;  %2126 = vmatpush1.bf16.msra.mxu1 %v3027_v63  ;;  %v3114_v62 = vld [vmem:[%s3620_s27 + $0x580] ss:$16 sps:$4 sm:$0xff]   ;;  %v3117_v63 = vld [vmem:[%s3620_s27 + $0x588] ss:$16 sps:$4 sm:$0xff]  }
  0xf5   : > { %1955 = vmatprep.subr.bf16.mxu0 %v3032_v0  ;;  %2127 = vmatprep.subr.bf16.mxu1 %v3035_v1  ;;  %v3122_v0 = vld [vmem:[%s3620_s27 + $0x5a4] ss:$16 sps:$4 sm:$0xff]   ;;  %v3125_v1 = vld [vmem:[%s3620_s27 + $0x5ac] ss:$16 sps:$4 sm:$0xff]  }
  0xf8   : > { %1956 = vmatpush1.bf16.msra.mxu0 %v3030_v2  ;;  %2128 = vmatpush1.bf16.msra.mxu1 %v3033_v3  ;;  %v3120_v2 = vld [vmem:[%s3620_s27 + $0x5a0] ss:$16 sps:$4 sm:$0xff]   ;;  %v3123_v3 = vld [vmem:[%s3620_s27 + $0x5a8] ss:$16 sps:$4 sm:$0xff]  }
  0xf9   : > { %1957 = vmatprep.subr.bf16.mxu0 %v3038_v4  ;;  %2129 = vmatprep.subr.bf16.mxu1 %v3041_v5  ;;  %v3128_v4 = vld [vmem:[%s3620_s27 + $0x5c4] ss:$16 sps:$4 sm:$0xff]   ;;  %v3131_v5 = vld [vmem:[%s3620_s27 + $0x5cc] ss:$16 sps:$4 sm:$0xff]  }
  0xfc   : > { %1958 = vmatpush1.bf16.msra.mxu0 %v3036_v6  ;;  %2130 = vmatpush1.bf16.msra.mxu1 %v3039_v7  ;;  %v3126_v6 = vld [vmem:[%s3620_s27 + $0x5c0] ss:$16 sps:$4 sm:$0xff]   ;;  %v3129_v7 = vld [vmem:[%s3620_s27 + $0x5c8] ss:$16 sps:$4 sm:$0xff]  }
  0xfd   : > { %1970 = vmatprep.subr.bf16.mxu0 %v3044_v8  ;;  %2142 = vmatprep.subr.bf16.mxu1 %v3047_v9  ;;  %v3134_v8 = vld [vmem:[%s3620_s27 + $0x5e4] ss:$16 sps:$4 sm:$0xff]   ;;  %v3137_v9 = vld [vmem:[%s3620_s27 + $0x5ec] ss:$16 sps:$4 sm:$0xff]  }
  0xff   : > { %1960 = vmatmul.mubr.bf16.vlgmr.msra.gmra.mrb[0].mxu0 %v2462_v10  ;;  %2132 = vmatmul.mubr.bf16.vlgmr.msra.gmra.mrb[0].mxu1 %v2462_v10  ;;  %v3132_v10 = vld [vmem:[%s3620_s27 + $0x5e0] ss:$16 sps:$4 sm:$0xff]  }
 0x100   : > { %1971 = vmatpush1.bf16.msra.mxu0 %v3042_v11  ;;  %2143 = vmatpush1.bf16.msra.mxu1 %v3045_v12  ;;  %v3135_v11 = vld [vmem:[%s3620_s27 + $0x5e8] ss:$16 sps:$4 sm:$0xff]   ;;  %v3140_v12 = vld [vmem:[%s3620_s27 + $0x604] ss:$16 sps:$4 sm:$0xff]  }
 0x101   : > { %1972 = vmatprep.subr.bf16.mxu0 %v3050_v13  ;;  %2144 = vmatprep.subr.bf16.mxu1 %v3053_v14  ;;  %v3143_v13 = vld [vmem:[%s3620_s27 + $0x60c] ss:$16 sps:$4 sm:$0xff]   ;;  %v2464_v14 = vcombine.low %v3778_v15, %v3781_v16  ;;  %v3144_v16 = vld [vmem:[%s3620_s27 + $0x620] ss:$16 sps:$4 sm:$0xff]  }
 0x102   : > { %2002 = vmatprep.mubr.bf16.mxu0 %v2465_v17  ;;  %2174 = vmatprep.mubr.bf16.mxu1 %v2465_v17  ;;  %v3848_v17 = vld [vmem:[%s3613_s24 + $0x18] sm:$0xff] }
 0x104   : > { %1973 = vmatpush1.bf16.msra.mxu0 %v3048_v18  ;;  %2145 = vmatpush1.bf16.msra.mxu1 %v3051_v19  ;;  %v3851_v18 = vld [vmem:[%s3613_s24 + $0x38] sm:$0xff]  ;;  %v3138_v19 = vld [vmem:[%s3620_s27 + $0x600] ss:$16 sps:$4 sm:$0xff]  }
 0x105   : > { %1974 = vmatprep.subr.bf16.mxu0 %v3056_v20  ;;  %2146 = vmatprep.subr.bf16.mxu1 %v3059_v21  ;;  %v3141_v20 = vld [vmem:[%s3620_s27 + $0x608] ss:$16 sps:$4 sm:$0xff]   ;;  %v3146_v21 = vld [vmem:[%s3620_s27 + $0x624] ss:$16 sps:$4 sm:$0xff]   ;;  %v2467_v15 = vcombine.high %v3848_v17, %v3851_v18 }
 0x108   : > { %1975 = vmatpush1.bf16.msra.mxu0 %v3054_v22  ;;  %2147 = vmatpush1.bf16.msra.mxu1 %v3057_v23  ;;  %v3149_v22 = vld [vmem:[%s3620_s27 + $0x62c] ss:$16 sps:$4 sm:$0xff]   ;;  %v3147_v23 = vld [vmem:[%s3620_s27 + $0x628] ss:$16 sps:$4 sm:$0xff]  }
 0x109   : > { %1976 = vmatprep.subr.bf16.mxu0 %v3062_v24  ;;  %2148 = vmatprep.subr.bf16.mxu1 %v3065_v25  ;;  %v3152_v24 = vld [vmem:[%s3620_s27 + $0x644] ss:$16 sps:$4 sm:$0xff]   ;;  %v3155_v25 = vld [vmem:[%s3620_s27 + $0x64c] ss:$16 sps:$4 sm:$0xff]  }
 0x10c   : > { %1977 = vmatpush1.bf16.msra.mxu0 %v3060_v26  ;;  %2149 = vmatpush1.bf16.msra.mxu1 %v3063_v27  ;;  %v3150_v26 = vld [vmem:[%s3620_s27 + $0x640] ss:$16 sps:$4 sm:$0xff]   ;;  %v3153_v27 = vld [vmem:[%s3620_s27 + $0x648] ss:$16 sps:$4 sm:$0xff]  }
 0x10d   : > { %1978 = vmatprep.subr.bf16.mxu0 %v3068_v28  ;;  %2150 = vmatprep.subr.bf16.mxu1 %v3071_v29  ;;  %v3158_v28 = vld [vmem:[%s3620_s27 + $0x664] ss:$16 sps:$4 sm:$0xff]   ;;  %v3161_v29 = vld [vmem:[%s3620_s27 + $0x66c] ss:$16 sps:$4 sm:$0xff]  }
 0x110   : > { %1979 = vmatpush1.bf16.msra.mxu0 %v3066_v30  ;;  %2151 = vmatpush1.bf16.msra.mxu1 %v3069_v31  ;;  %v3156_v30 = vld [vmem:[%s3620_s27 + $0x660] ss:$16 sps:$4 sm:$0xff]   ;;  %v3159_v31 = vld [vmem:[%s3620_s27 + $0x668] ss:$16 sps:$4 sm:$0xff]  }
 0x111   : > { %1980 = vmatprep.subr.bf16.mxu0 %v3074_v32  ;;  %2152 = vmatprep.subr.bf16.mxu1 %v3077_v33  ;;  %v3164_v32 = vld [vmem:[%s3620_s27 + $0x684] ss:$16 sps:$4 sm:$0xff]   ;;  %v3167_v33 = vld [vmem:[%s3620_s27 + $0x68c] ss:$16 sps:$4 sm:$0xff]  }
 0x114   : > { %1981 = vmatpush1.bf16.msra.mxu0 %v3072_v34  ;;  %2153 = vmatpush1.bf16.msra.mxu1 %v3075_v35  ;;  %v3162_v34 = vld [vmem:[%s3620_s27 + $0x680] ss:$16 sps:$4 sm:$0xff]   ;;  %v3165_v35 = vld [vmem:[%s3620_s27 + $0x688] ss:$16 sps:$4 sm:$0xff]  }
 0x115   : > { %1982 = vmatprep.subr.bf16.mxu0 %v3080_v36  ;;  %2154 = vmatprep.subr.bf16.mxu1 %v3083_v37  ;;  %v3170_v36 = vld [vmem:[%s3620_s27 + $0x6a4] ss:$16 sps:$4 sm:$0xff]   ;;  %v3173_v37 = vld [vmem:[%s3620_s27 + $0x6ac] ss:$16 sps:$4 sm:$0xff]  }
 0x118   : > { %1983 = vmatpush1.bf16.msra.mxu0 %v3078_v38  ;;  %2155 = vmatpush1.bf16.msra.mxu1 %v3081_v39  ;;  %v3168_v38 = vld [vmem:[%s3620_s27 + $0x6a0] ss:$16 sps:$4 sm:$0xff]   ;;  %v3171_v39 = vld [vmem:[%s3620_s27 + $0x6a8] ss:$16 sps:$4 sm:$0xff]  }
 0x119   : > { %1984 = vmatprep.subr.bf16.mxu0 %v3086_v40  ;;  %2156 = vmatprep.subr.bf16.mxu1 %v3089_v41  ;;  %v3176_v40 = vld [vmem:[%s3620_s27 + $0x6c4] ss:$16 sps:$4 sm:$0xff]   ;;  %v3179_v41 = vld [vmem:[%s3620_s27 + $0x6cc] ss:$16 sps:$4 sm:$0xff]  }
 0x11c   : > { %1985 = vmatpush1.bf16.msra.mxu0 %v3084_v42  ;;  %2157 = vmatpush1.bf16.msra.mxu1 %v3087_v43  ;;  %v3174_v42 = vld [vmem:[%s3620_s27 + $0x6c0] ss:$16 sps:$4 sm:$0xff]   ;;  %v3177_v43 = vld [vmem:[%s3620_s27 + $0x6c8] ss:$16 sps:$4 sm:$0xff]  }
 0x11d   : > { %1986 = vmatprep.subr.bf16.mxu0 %v3092_v44  ;;  %2158 = vmatprep.subr.bf16.mxu1 %v3095_v45  ;;  %v3182_v44 = vld [vmem:[%s3620_s27 + $0x6e4] ss:$16 sps:$4 sm:$0xff]   ;;  %v3185_v45 = vld [vmem:[%s3620_s27 + $0x6ec] ss:$16 sps:$4 sm:$0xff]  }
 0x120   : > { %1987 = vmatpush1.bf16.msra.mxu0 %v3090_v46  ;;  %2159 = vmatpush1.bf16.msra.mxu1 %v3093_v47  ;;  %v3180_v46 = vld [vmem:[%s3620_s27 + $0x6e0] ss:$16 sps:$4 sm:$0xff]   ;;  %v3183_v47 = vld [vmem:[%s3620_s27 + $0x6e8] ss:$16 sps:$4 sm:$0xff]  }
 0x121   : > { %1988 = vmatprep.subr.bf16.mxu0 %v3098_v48  ;;  %2160 = vmatprep.subr.bf16.mxu1 %v3101_v49  ;;  %v3188_v48 = vld [vmem:[%s3620_s27 + $0x704] ss:$16 sps:$4 sm:$0xff]   ;;  %v3191_v49 = vld [vmem:[%s3620_s27 + $0x70c] ss:$16 sps:$4 sm:$0xff]  }
 0x124   : > { %1989 = vmatpush1.bf16.msra.mxu0 %v3096_v50  ;;  %2161 = vmatpush1.bf16.msra.mxu1 %v3099_v51  ;;  %v3186_v50 = vld [vmem:[%s3620_s27 + $0x700] ss:$16 sps:$4 sm:$0xff]   ;;  %v3189_v51 = vld [vmem:[%s3620_s27 + $0x708] ss:$16 sps:$4 sm:$0xff]  }
 0x125   : > { %1990 = vmatprep.subr.bf16.mxu0 %v3104_v52  ;;  %2162 = vmatprep.subr.bf16.mxu1 %v3107_v53  ;;  %v3194_v52 = vld [vmem:[%s3620_s27 + $0x724] ss:$16 sps:$4 sm:$0xff]   ;;  %v3197_v53 = vld [vmem:[%s3620_s27 + $0x72c] ss:$16 sps:$4 sm:$0xff]  }
 0x128   : > { %1991 = vmatpush1.bf16.msra.mxu0 %v3102_v54  ;;  %2163 = vmatpush1.bf16.msra.mxu1 %v3105_v55  ;;  %v3192_v54 = vld [vmem:[%s3620_s27 + $0x720] ss:$16 sps:$4 sm:$0xff]   ;;  %v3195_v55 = vld [vmem:[%s3620_s27 + $0x728] ss:$16 sps:$4 sm:$0xff]  }
 0x129   : > { %1992 = vmatprep.subr.bf16.mxu0 %v3110_v56  ;;  %2164 = vmatprep.subr.bf16.mxu1 %v3113_v57  ;;  %v3200_v56 = vld [vmem:[%s3620_s27 + $0x744] ss:$16 sps:$4 sm:$0xff]   ;;  %v3203_v57 = vld [vmem:[%s3620_s27 + $0x74c] ss:$16 sps:$4 sm:$0xff]  }
 0x12c   : > { %1993 = vmatpush1.bf16.msra.mxu0 %v3108_v58  ;;  %2165 = vmatpush1.bf16.msra.mxu1 %v3111_v59  ;;  %v3198_v58 = vld [vmem:[%s3620_s27 + $0x740] ss:$16 sps:$4 sm:$0xff]   ;;  %v3201_v59 = vld [vmem:[%s3620_s27 + $0x748] ss:$16 sps:$4 sm:$0xff]  }
 0x12d   : > { %1994 = vmatprep.subr.bf16.mxu0 %v3116_v60  ;;  %2166 = vmatprep.subr.bf16.mxu1 %v3119_v61  ;;  %v3206_v60 = vld [vmem:[%s3620_s27 + $0x764] ss:$16 sps:$4 sm:$0xff]   ;;  %v3209_v61 = vld [vmem:[%s3620_s27 + $0x76c] ss:$16 sps:$4 sm:$0xff]  }
 0x130   : > { %1995 = vmatpush1.bf16.msra.mxu0 %v3114_v62  ;;  %2167 = vmatpush1.bf16.msra.mxu1 %v3117_v63  ;;  %v3204_v62 = vld [vmem:[%s3620_s27 + $0x760] ss:$16 sps:$4 sm:$0xff]   ;;  %v3207_v63 = vld [vmem:[%s3620_s27 + $0x768] ss:$16 sps:$4 sm:$0xff]  }
 0x131   : > { %1996 = vmatprep.subr.bf16.mxu0 %v3122_v0  ;;  %2168 = vmatprep.subr.bf16.mxu1 %v3125_v1  ;;  %v3212_v0 = vld [vmem:[%s3620_s27 + $0x784] ss:$16 sps:$4 sm:$0xff]   ;;  %v3215_v1 = vld [vmem:[%s3620_s27 + $0x78c] ss:$16 sps:$4 sm:$0xff]  }
 0x134   : > { %1997 = vmatpush1.bf16.msra.mxu0 %v3120_v2  ;;  %2169 = vmatpush1.bf16.msra.mxu1 %v3123_v3  ;;  %v3210_v2 = vld [vmem:[%s3620_s27 + $0x780] ss:$16 sps:$4 sm:$0xff]   ;;  %v3213_v3 = vld [vmem:[%s3620_s27 + $0x788] ss:$16 sps:$4 sm:$0xff]  }
 0x135   : > { %1998 = vmatprep.subr.bf16.mxu0 %v3128_v4  ;;  %2170 = vmatprep.subr.bf16.mxu1 %v3131_v5  ;;  %v3218_v4 = vld [vmem:[%s3620_s27 + $0x7a4] ss:$16 sps:$4 sm:$0xff]   ;;  %v3221_v5 = vld [vmem:[%s3620_s27 + $0x7ac] ss:$16 sps:$4 sm:$0xff]  }
 0x138   : > { %1999 = vmatpush1.bf16.msra.mxu0 %v3126_v6  ;;  %2171 = vmatpush1.bf16.msra.mxu1 %v3129_v7  ;;  %v3216_v6 = vld [vmem:[%s3620_s27 + $0x7a0] ss:$16 sps:$4 sm:$0xff]   ;;  %v3219_v7 = vld [vmem:[%s3620_s27 + $0x7a8] ss:$16 sps:$4 sm:$0xff]  }
 0x139   : > { %2000 = vmatprep.subr.bf16.mxu0 %v3134_v8  ;;  %2172 = vmatprep.subr.bf16.mxu1 %v3137_v9  ;;  %v3224_v8 = vld [vmem:[%s3620_s27 + $0x7c4] ss:$16 sps:$4 sm:$0xff]   ;;  %v3227_v9 = vld [vmem:[%s3620_s27 + $0x7cc] ss:$16 sps:$4 sm:$0xff]  }
 0x13c   : > { %2001 = vmatpush1.bf16.msra.mxu0 %v3132_v10  ;;  %2173 = vmatpush1.bf16.msra.mxu1 %v3135_v11  ;;  %v3222_v10 = vld [vmem:[%s3620_s27 + $0x7c0] ss:$16 sps:$4 sm:$0xff]   ;;  %v3225_v11 = vld [vmem:[%s3620_s27 + $0x7c8] ss:$16 sps:$4 sm:$0xff]  }
 0x13d   : > { %2013 = vmatprep.subr.bf16.mxu0 %v3140_v12  ;;  %2185 = vmatprep.subr.bf16.mxu1 %v3143_v13  ;;  %v3230_v12 = vld [vmem:[%s3620_s27 + $0x7e4] ss:$16 sps:$4 sm:$0xff]   ;;  %v3233_v13 = vld [vmem:[%s3620_s27 + $0x7ec] ss:$16 sps:$4 sm:$0xff]  }
 0x13f   : > { %2003 = vmatmul.mubr.bf16.vlgmr.msra.gmra.mrb[0].mxu0 %v2464_v14  ;;  %2175 = vmatmul.mubr.bf16.vlgmr.msra.gmra.mrb[0].mxu1 %v2464_v14  ;;  %v3228_v14 = vld [vmem:[%s3620_s27 + $0x7e0] ss:$16 sps:$4 sm:$0xff]  }
 0x140   : > { %2014 = vmatpush1.bf16.msra.mxu0 %v3138_v19  ;;  %2186 = vmatpush1.bf16.msra.mxu1 %v3141_v20  ;;  %v3231_v19 = vld [vmem:[%s3620_s27 + $0x7e8] ss:$16 sps:$4 sm:$0xff]   ;;  %v2466_v20 = vcombine.low %v3848_v17, %v3851_v18 }
 0x141   : > { %2015 = vmatprep.subr.bf16.mxu0 %v3146_v21  ;;  %2187 = vmatprep.subr.bf16.mxu1 %v3149_v22  ;;  %v292_v21 = vld [vmem:[#allocation2] sm:$0xff]  ;;  %v294_v22 = vld [vmem:[#allocation2 + $0x10] sm:$0xff] }
 0x142   : > { %2045 = vmatprep.mubr.bf16.mxu0 %v2467_v15  ;;  %2217 = vmatprep.mubr.bf16.mxu1 %v2467_v15  ;;  %v293_v15 = vld [vmem:[#allocation2 + $0x8] sm:$0xff] }
 0x144   : > { %2016 = vmatpush1.bf16.msra.mxu0 %v3144_v16  ;;  %2188 = vmatpush1.bf16.msra.mxu1 %v3147_v23  ;;  %v295_v16 = vld [vmem:[#allocation2 + $0x18] sm:$0xff] }
 0x145   : > { %2017 = vmatprep.subr.bf16.mxu0 %v3152_v24  ;;  %2189 = vmatprep.subr.bf16.mxu1 %v3155_v25  ;;  %v296_v25 = vld [vmem:[#allocation2 + $0x20] sm:$0xff] }
 0x148   : > { %2018 = vmatpush1.bf16.msra.mxu0 %v3150_v26  ;;  %2190 = vmatpush1.bf16.msra.mxu1 %v3153_v27  ;;  %v298_v26 = vld [vmem:[#allocation2 + $0x30] sm:$0xff] }
 0x149   : > { %2019 = vmatprep.subr.bf16.mxu0 %v3158_v28  ;;  %2191 = vmatprep.subr.bf16.mxu1 %v3161_v29 }
 0x14c   : > { %2020 = vmatpush1.bf16.msra.mxu0 %v3156_v30  ;;  %2192 = vmatpush1.bf16.msra.mxu1 %v3159_v31  ;;  %v297_v31 = vld [vmem:[#allocation2 + $0x28] sm:$0xff] }
 0x14d   : > { %2021 = vmatprep.subr.bf16.mxu0 %v3164_v32  ;;  %2193 = vmatprep.subr.bf16.mxu1 %v3167_v33  ;;  %v299_v32 = vld [vmem:[#allocation2 + $0x38] sm:$0xff] }
 0x150   : > { %2022 = vmatpush1.bf16.msra.mxu0 %v3162_v34  ;;  %2194 = vmatpush1.bf16.msra.mxu1 %v3165_v35 }
 0x151   : > { %2023 = vmatprep.subr.bf16.mxu0 %v3170_v36  ;;  %2195 = vmatprep.subr.bf16.mxu1 %v3173_v37 }
 0x154   : > { %2024 = vmatpush1.bf16.msra.mxu0 %v3168_v38  ;;  %2196 = vmatpush1.bf16.msra.mxu1 %v3171_v39 }
 0x155   : > { %2025 = vmatprep.subr.bf16.mxu0 %v3176_v40  ;;  %2197 = vmatprep.subr.bf16.mxu1 %v3179_v41  ;;  %v2258_v41 = vlaneseq (!%p2724_p6) }
 0x158   : > { %2026 = vmatpush1.bf16.msra.mxu0 %v3174_v42  ;;  %2198 = vmatpush1.bf16.msra.mxu1 %v3177_v43  ;;  %v2259_v42 = vshrl.u32 (!%p2724_p6), %v2258_v41, 7  ;;  %v2256_v43 = vld [vmem:[#allocation8] sm:$0xf] (!%p2724_p6) }
 0x159   : > { %2027 = vmatprep.subr.bf16.mxu0 %v3182_v44  ;;  %2199 = vmatprep.subr.bf16.mxu1 %v3185_v45 }
 0x15c   : > { %2028 = vmatpush1.bf16.msra.mxu0 %v3180_v46  ;;  %2200 = vmatpush1.bf16.msra.mxu1 %v3183_v47  ;;  %v2260_v46 = vsub.s32 (!%p2724_p6), 0, %v2259_v42  ;;  %v2264_v47 = vsub.s32 (!%p2724_p6), 1, %v2259_v42 }
 0x15d   : > { %2029 = vmatprep.subr.bf16.mxu0 %v3188_v48  ;;  %2201 = vmatprep.subr.bf16.mxu1 %v3191_v49  ;;  %v2268_v48 = vsub.s32 (!%p2724_p6), 2, %v2259_v42  ;;  %v2272_v49 = vsub.s32 (!%p2724_p6), 3, %v2259_v42 }
 0x160   : > { %2030 = vmatpush1.bf16.msra.mxu0 %v3186_v50  ;;  %2202 = vmatpush1.bf16.msra.mxu1 %v3189_v51 }
 0x161   : > { %2031 = vmatprep.subr.bf16.mxu0 %v3194_v52  ;;  %2203 = vmatprep.subr.bf16.mxu1 %v3197_v53  ;;  %v2261_v53 = vrot.slane (!%p2724_p6), %v2256_v43, %v2260_v46 }
 0x164   : > { %2032 = vmatpush1.bf16.msra.mxu0 %v3192_v54  ;;  %2204 = vmatpush1.bf16.msra.mxu1 %v3195_v55  ;;  %v2265_v54 = vrot.slane (!%p2724_p6), %v2256_v43, %v2264_v47  ;;  %v2269_v55 = vrot.slane (!%p2724_p6), %v2256_v43, %v2268_v48 }
 0x165   : > { %2033 = vmatprep.subr.bf16.mxu0 %v3200_v56  ;;  %2205 = vmatprep.subr.bf16.mxu1 %v3203_v57  ;;  %v2273_v56 = vrot.slane (!%p2724_p6), %v2256_v43, %v2272_v49 }
 0x168   : > { %2034 = vmatpush1.bf16.msra.mxu0 %v3198_v58  ;;  %2206 = vmatpush1.bf16.msra.mxu1 %v3201_v59 }
 0x169   : > { %2035 = vmatprep.subr.bf16.mxu0 %v3206_v60  ;;  %2207 = vmatprep.subr.bf16.mxu1 %v3209_v61 }
 0x16c   : > { %2036 = vmatpush1.bf16.msra.mxu0 %v3204_v62  ;;  %2208 = vmatpush1.bf16.msra.mxu1 %v3207_v63 }
 0x16d   : > { %2037 = vmatprep.subr.bf16.mxu0 %v3212_v0  ;;  %2209 = vmatprep.subr.bf16.mxu1 %v3215_v1 }
 0x170   : > { %2038 = vmatpush1.bf16.msra.mxu0 %v3210_v2  ;;  %2210 = vmatpush1.bf16.msra.mxu1 %v3213_v3 }
 0x171   : > { %2039 = vmatprep.subr.bf16.mxu0 %v3218_v4  ;;  %2211 = vmatprep.subr.bf16.mxu1 %v3221_v5 }
 0x174   : > { %2040 = vmatpush1.bf16.msra.mxu0 %v3216_v6  ;;  %2212 = vmatpush1.bf16.msra.mxu1 %v3219_v7 }
 0x175   : > { %2041 = vmatprep.subr.bf16.mxu0 %v3224_v8  ;;  %2213 = vmatprep.subr.bf16.mxu1 %v3227_v9 }
 0x178   : > { %2042 = vmatpush1.bf16.msra.mxu0 %v3222_v10  ;;  %2214 = vmatpush1.bf16.msra.mxu1 %v3225_v11 }
 0x179   : > { %2043 = vmatprep.subr.bf16.mxu0 %v3230_v12  ;;  %2215 = vmatprep.subr.bf16.mxu1 %v3233_v13 }
 0x17c   : > { %2044 = vmatpush1.bf16.msra.mxu0 %v3228_v14  ;;  %2216 = vmatpush1.bf16.msra.mxu1 %v3231_v19 }
 0x17f   : > { %2046 = vmatmul.mubr.bf16.vlgmr.msra.gmra.mrb[0].mxu0 %v2466_v20  ;;  %2218 = vmatmul.mubr.bf16.vlgmr.msra.gmra.mrb[0].mxu1 %v2466_v20 }
 0x252   : > { %v2047_v23 = vpop.f32.mrb[0].mxu0  ;;  %v2219_v24 = vpop.f32.mrb[0].mxu1  ;;  %2247 = sbr.rel (%p2724_p6) target bundleno = 615 (0x267), region = 52 }
 0x253   : > { %v2228_v27 = vadd.f32 %v2047_v23, %v292_v21  ;;  %v2230_v28 = vadd.f32 %v2219_v24, %v294_v22  ;;  %v2049_v29 = vpop.f32.mrb[1].mxu0  ;;  %v2221_v30 = vpop.f32.mrb[1].mxu1 }
 0x254   : > { %v2229_v33 = vadd.f32 %v2049_v29, %v293_v15  ;;  %v2231_v17 = vadd.f32 %v2221_v30, %v295_v16  ;;  %v2051_v18 = vpop.f32.mrb[2].mxu0  ;;  %v2223_v34 = vpop.f32.mrb[2].mxu1 }
 0x255   : > { %2236 = vst [vmem:[#allocation2] sm:$0xff] %v2228_v27  ;;  %2238 = vst [vmem:[#allocation2 + $0x10] sm:$0xff] %v2230_v28  ;;  %v2232_v35 = vadd.f32 %v2051_v18, %v296_v25  ;;  %v2234_v36 = vadd.f32 %v2223_v34, %v298_v26  ;;  %v2053_v37 = vpop.f32.mrb[3].mxu0  ;;  %v2225_v38 = vpop.f32.mrb[3].mxu1 }
 0x256   : > { %2237 = vst [vmem:[#allocation2 + $0x8] sm:$0xff] %v2229_v33  ;;  %2239 = vst [vmem:[#allocation2 + $0x18] sm:$0xff] %v2231_v17  ;;  %v2233_v39 = vadd.f32 %v2053_v37, %v297_v31  ;;  %v2235_v40 = vadd.f32 %v2225_v38, %v299_v32 }
 0x257   : > { %2240 = vst [vmem:[#allocation2 + $0x20] sm:$0xff] %v2232_v35  ;;  %2242 = vst [vmem:[#allocation2 + $0x30] sm:$0xff] %v2234_v36 }
 0x258   : > { %2241 = vst [vmem:[#allocation2 + $0x28] sm:$0xff] %v2233_v39  ;;  %2243 = vst [vmem:[#allocation2 + $0x38] sm:$0xff] %v2235_v40 }
 0x25c   : > { %v2248_v44 = vld [vmem:[#allocation2] sm:$0xff]  ;;  %v2250_v50 = vld [vmem:[#allocation2 + $0x10] sm:$0xff] }
 0x25d   : > { %v2249_v45 = vld [vmem:[#allocation2 + $0x8] sm:$0xff]  ;;  %v2251_v51 = vld [vmem:[#allocation2 + $0x18] sm:$0xff]  ;;  %v2278_v60 = vadd.f32 %v2261_v53, %v2248_v44  ;;  %v2280_v62 = vadd.f32 %v2269_v55, %v2250_v50 }
 0x25e   : > { %v2252_v52 = vld [vmem:[#allocation2 + $0x20] sm:$0xff]  ;;  %v2254_v58 = vld [vmem:[#allocation2 + $0x30] sm:$0xff]  ;;  %v2279_v61 = vadd.f32 %v2265_v54, %v2249_v45  ;;  %v2281_v63 = vadd.f32 %v2273_v56, %v2251_v51 }
 0x25f   : > { %v2253_v57 = vld [vmem:[#allocation2 + $0x28] sm:$0xff]  ;;  %v2255_v59 = vld [vmem:[#allocation2 + $0x38] sm:$0xff]  ;;  %v2282_v0 = vadd.f32 %v2261_v53, %v2252_v52  ;;  %v2284_v2 = vadd.f32 %v2269_v55, %v2254_v58  ;;  %v2286_v4 = vmax.f32 %v2278_v60, 0.0  ;;  %v2288_v6 = vmax.f32 %v2280_v62, 0.0 }
 0x260   : > { %v2283_v1 = vadd.f32 %v2265_v54, %v2253_v57  ;;  %v2285_v3 = vadd.f32 %v2273_v56, %v2255_v59  ;;  %v2287_v5 = vmax.f32 %v2279_v61, 0.0  ;;  %v2289_v7 = vmax.f32 %v2281_v63, 0.0 }
 0x261   : > { %v2290_v8 = vmax.f32 %v2282_v0, 0.0  ;;  %v2292_v10 = vmax.f32 %v2284_v2, 0.0 }
 0x262   : > { %v2291_v9 = vmax.f32 %v2283_v1, 0.0  ;;  %v2293_v11 = vmax.f32 %v2285_v3, 0.0  ;;  %v2736_v12 = vpack.c.bf16 %v2287_v5, %v2286_v4  ;;  %v2737_v13 = vpack.c.bf16 %v2289_v7, %v2288_v6 }
 0x264   : > { %v2738_v14 = vpack.c.bf16 %v2291_v9, %v2290_v8  ;;  %v2739_v19 = vpack.c.bf16 %v2293_v11, %v2292_v10  ;;  %2318 = vst [vmem:[#allocation9] sm:$0xff] %v2736_v12  ;;  %2319 = vst [vmem:[#allocation9 + $0x8] sm:$0xff] %v2737_v13 }
 0x266   : > { %2320 = vst [vmem:[#allocation9 + $0x10] sm:$0xff] %v2738_v14  ;;  %2321 = vst [vmem:[#allocation9 + $0x18] sm:$0xff] %v2739_v19 }
 0x267 PF: > { %p2790_p8 = scmp.eq.s32.totalorder %s3473_s18, 3  ;;  %s3421_s15 = smov [#allocation9]  }
 0x268   : > { %s2334_s20 = sshll.u32 %s3421_s15, 4  ;;  %s2335_s20 = int_to_ptr.vmem [resolvable:$true] %s2334_s20 }
 0x269   : > { %s3322_s21 = scalar_lea.vmem %s2335_s20, 512  ;;  %p3329_p0 = scmp.lt.s32.totalorder %s2335_s20, %s2335_s20 }
 0x26a   : > { %p3323_p13 = scmp.ne.s32.totalorder %s2335_s20, %s3322_s21  ;;  %p3330_p5 = scmp.lt.s32.totalorder %s3322_s21, %s3322_s21 }
 0x26c   : > { %p3324_p1 = pnand %p3323_p13, %p2790_p8  ;;  %p3331_p7 = por %p3330_p5, %p3329_p0 }
 0x26e   : > { %p3325_p2 = pneg %p3324_p1 }
 0x270   : > { %p3332_p9 = pnand %p3331_p7, %p3325_p2 }
 0x272   : > { %3335 = shalt.err (!%p3332_p9)
}
 0x273   : > { %s3336_s5 = scalar_lea.hbm %s3964_s3, 512 }
 0x274   : > { %p3337_p12 = scmp.ne.s32.totalorder %s3964_s3, %s3336_s5  ;;  %p3342_p10 = scmp.lt.u32.totalorder %s3336_s5, %s3964_s3 }
 0x276   : > { %p3338_p4 = pnand %p3337_p12, %p2790_p8 }
 0x278   : > { %p3339_p11 = pneg %p3338_p4 }
 0x27a   : > { %p3344_p3 = pnand %p3342_p10, %p3339_p11 }
 0x27c   : > { %3347 = shalt.err (!%p3344_p3)
}
 0x27d   : > { %s3422_s8 = smov 256   ;;  %s3423_s0 = smov 16  }
 0x27e   : > { %2773 = dma.vmem_to_hbm [thread:$0]  (%p2790_p8), %s2335_s20, 512, %s3964_s3, [#allocation5], %s3422_s8, %s3422_s8, %s3423_s0  }
 0x27f   : > { %3385 = dma.done.wait (%p2790_p8), [#allocation5], 512  }
 0x280   : > { %3387 = vsyncadd (%p2790_p8), [#allocation5], 4294966784 }
 0x281 PF: > { %s20_s17 = sadd.s32 1, %s3410_s17   ;;  %s3980_s12 = smov %s3394_s13 }
 0x282   : > { %p17_p6 = scmp.ge.s32.totalorder %s20_s17, 6   ;;  %s3981_s13 = smov %s3398_s14 }
 0x283   : > { %s3982_s14 = smov %s3543_s4  ;;  %s3983_s15 = smov %s3406_s16 }
 0x284   : > { %s3984_s16 = smov %s3986_s10  ;;  %19 = sbr.rel (!%p17_p6) target bundleno = 9 (0x9), region = 96 }
 0x28b   :  { %2350 = vsyncpa [#allocation4], 1 }
 0x28c   :  { %2352 = vsyncpa [#allocation4 + $0x1], 1 }
 0x28d   :  { %2353 = vsyncpa [#allocation7], 1 }
 0x28e   :  { %2355 = vsyncpa [#allocation7 + $0x1], 1 }
 0x28f   :  { %2356 = vsyncpa [#allocation5], 1 }
 0x290   :  { %2358 = vsyncpa [#allocation5 + $0x1], 1 }

</bundles_post_ra>
